<compile_context>
chip_gen: v6e
topology: v6e:2x2x1
jax: 0.10.0
libtpu: 0.0.40
codegen_flags: <defaults>
</compile_context>

<pallas_src>
import functools

import jax
import jax.numpy as jnp
from jax import lax
from jax.experimental import pallas as pl
from jax.experimental.pallas import tpu as pltpu


# ----------------------------------------------------------------------------
# Tile-size helpers (no hard asserts; adapt to the problem size).
# ----------------------------------------------------------------------------
def _pick_hc_tile(hc):
    if hc <= 64:
        return hc
    for cand in (64, 32, 16, 8):
        if hc % cand == 0:
            return cand
    return hc


def _pick_tile_n(n):
    if n <= 512:
        return n
    for cand in (512, 256, 128):
        if n % cand == 0:
            return cand
    return n


# ----------------------------------------------------------------------------
# Kernel 1: fused backbone.
#   One pass over x (NCHW).  res2 = relu(1x1 conv), coarse = 1x1 conv of the
#   4x4 average pool.  K (=Cin) is tiny, so the convs are unrolled VPU FMAs
#   with the spatial W dim lane-dense; the pool is two separable matmuls.
# ----------------------------------------------------------------------------
def _backbone_kernel(x_ref, wr_ref, br_ref, wcz_ref, bc_ref, pht_ref, pw_ref,
                     res2_ref, coarse_ref, *, cin, cres2, ccls):
    # x_ref block: (1, Cin, 4*hc_tile, W)   -- W is the lane dimension.
    xs = [x_ref[0, c] for c in range(cin)]            # each (4*hc_tile, W)

    # res2 = relu(W_r x + b_r): per-output-channel VPU FMAs (skip MXU for K=4).
    for o in range(cres2):
        acc = wr_ref[o, 0] * xs[0]
        for c in range(1, cin):
            acc = acc + wr_ref[o, c] * xs[c]
        res2_ref[0, o] = jnp.maximum(acc + br_ref[o, 0], 0.0)

    # 4x4 average pool as two separable matmuls, then the 1x1 coarse conv.
    pht = pht_ref[...]                                 # (hc_tile, 4*hc_tile)
    pw = pw_ref[...]                                   # (W, Wc)
    pooled = [
        jnp.dot(jnp.dot(pht, xs[c], preferred_element_type=jnp.float32), pw,
                preferred_element_type=jnp.float32)
        for c in range(cin)
    ]                                                  # each (hc_tile, Wc)
    for o in range(ccls):
        acc = wcz_ref[o, 0] * pooled[0]
        for c in range(1, cin):
            acc = acc + wcz_ref[o, c] * pooled[c]
        coarse_ref[0, o] = acc + bc_ref[o, 0]


def fused_backbone(x, w_res2, b_res2, w_coarse, b_coarse, hc_tile):
    B, Cin, H, W = x.shape
    Hc, Wc = H // 4, W // 4
    Cres2 = w_res2.shape[0]
    Ccls = w_coarse.shape[0]
    ht = 4 * hc_tile
    n_h = Hc // hc_tile

    # Separable 4x4-mean pooling matrices (1/4 factors in each).
    pht = jnp.kron(jnp.eye(hc_tile, dtype=jnp.float32),
                   jnp.full((1, 4), 0.25, jnp.float32))            # (hc_tile, ht)
    pw = jnp.kron(jnp.eye(Wc, dtype=jnp.float32),
                  jnp.full((4, 1), 0.25, jnp.float32))             # (W, Wc)

    kernel = functools.partial(_backbone_kernel, cin=Cin, cres2=Cres2, ccls=Ccls)
    return pl.pallas_call(
        kernel,
        out_shape=(jax.ShapeDtypeStruct((B, Cres2, H, W), jnp.float32),
                   jax.ShapeDtypeStruct((B, Ccls, Hc, Wc), jnp.float32)),
        grid_spec=pltpu.PrefetchScalarGridSpec(
            num_scalar_prefetch=0,
            grid=(B, n_h),
            in_specs=[
                pl.BlockSpec((1, Cin, ht, W), lambda b, h: (b, 0, h, 0)),
                pl.BlockSpec(memory_space=pltpu.MemorySpace.SMEM),  # w_res2
                pl.BlockSpec(memory_space=pltpu.MemorySpace.SMEM),  # b_res2
                pl.BlockSpec(memory_space=pltpu.MemorySpace.SMEM),  # w_coarse
                pl.BlockSpec(memory_space=pltpu.MemorySpace.SMEM),  # b_coarse
                pl.BlockSpec((hc_tile, ht), lambda b, h: (0, 0)),   # pht
                pl.BlockSpec((W, Wc), lambda b, h: (0, 0)),         # pw
            ],
            out_specs=(
                pl.BlockSpec((1, Cres2, ht, W), lambda b, h: (b, 0, h, 0)),
                pl.BlockSpec((1, Ccls, hc_tile, Wc), lambda b, h: (b, 0, h, 0)),
            ),
        ),
        compiler_params=pltpu.CompilerParams(
            dimension_semantics=("parallel", "parallel")),
    )(x, w_res2, b_res2.reshape(Cres2, 1), w_coarse, b_coarse.reshape(Ccls, 1),
      pht, pw)


# ----------------------------------------------------------------------------
# Kernel 2: point head (gather-based bilinear point_sample + 1x1 Conv1d MLP).
#   Per point: 4 weighted row loads from the coarse map and 4 from the fine
#   map (indices/weights come from SMEM), accumulated into VMEM scratch; the
#   MLP is applied as dot_generals that contract the feature dim so the output
#   comes out already transposed as (Ccls, tile_n) -- lane-dense over points.
# ----------------------------------------------------------------------------
def _point_head_kernel(idx_ref, wgt_ref, coarse_ref, res2_ref,
                       wc_ref, wf_ref, b_ref, o_ref, cs_ref, fs_ref):
    b = pl.program_id(0)
    j = pl.program_id(1)
    tile_n = cs_ref.shape[0]
    base0 = j * (tile_n * 8)

    def body(i, carry):
        base = base0 + i * 8
        # coarse corners are entries 0..3, fine corners 4..7 of this point.
        cs = wgt_ref[b, base] * coarse_ref[0, pl.ds(idx_ref[b, base], 1), :]
        for k in range(1, 4):
            cs = cs + wgt_ref[b, base + k] * coarse_ref[
                0, pl.ds(idx_ref[b, base + k], 1), :]
        fs = wgt_ref[b, base + 4] * res2_ref[0, pl.ds(idx_ref[b, base + 4], 1), :]
        for k in range(5, 8):
            fs = fs + wgt_ref[b, base + k] * res2_ref[
                0, pl.ds(idx_ref[b, base + k], 1), :]
        cs_ref[pl.ds(i, 1), :] = cs
        fs_ref[pl.ds(i, 1), :] = fs
        return carry

    lax.fori_loop(0, tile_n, body, 0)

    # rend^T = W_c . cs^T + W_f . fs^T + b  (contract the feature dims so the
    # result is (Ccls, tile_n): lane-dense stores, no wrapper transpose).
    rend_t = (lax.dot_general(wc_ref[...], cs_ref[...],
                              (((1,), (1,)), ((), ())),
                              preferred_element_type=jnp.float32)
              + lax.dot_general(wf_ref[...], fs_ref[...],
                                (((1,), (1,)), ((), ())),
                                preferred_element_type=jnp.float32)
              + b_ref[...])
    o_ref[0] = rend_t.astype(o_ref.dtype)


def point_head(idx_all, wgt_all, coarse_pts, res2_pts, w_mlp_c, w_mlp_f, b_mlp):
    B, Pc, Ccls = coarse_pts.shape
    _, Pf, Cres2 = res2_pts.shape
    N = wgt_all.shape[1] // 8
    tile_n = _pick_tile_n(N)
    n_tiles = N // tile_n
    return pl.pallas_call(
        _point_head_kernel,
        out_shape=jax.ShapeDtypeStruct((B, Ccls, N), jnp.float32),
        grid_spec=pltpu.PrefetchScalarGridSpec(
            num_scalar_prefetch=0,
            grid=(B, n_tiles),
            in_specs=[
                pl.BlockSpec(memory_space=pltpu.MemorySpace.SMEM),  # corner idx
                pl.BlockSpec(memory_space=pltpu.MemorySpace.SMEM),  # corner wgt
                pl.BlockSpec((1, Pc, Ccls), lambda b, j: (b, 0, 0)),
                pl.BlockSpec((1, Pf, Cres2), lambda b, j: (b, 0, 0)),
                pl.BlockSpec((Ccls, Ccls), lambda b, j: (0, 0)),
                pl.BlockSpec((Ccls, Cres2), lambda b, j: (0, 0)),
                pl.BlockSpec((Ccls, 1), lambda b, j: (0, 0)),
            ],
            out_specs=pl.BlockSpec((1, Ccls, tile_n), lambda b, j: (b, 0, j)),
            scratch_shapes=[pltpu.VMEM((tile_n, Ccls), jnp.float32),
                            pltpu.VMEM((tile_n, Cres2), jnp.float32)],
        ),
        compiler_params=pltpu.CompilerParams(
            dimension_semantics=("parallel", "parallel")),
    )(idx_all, wgt_all, coarse_pts, res2_pts, w_mlp_c, w_mlp_f,
      b_mlp.reshape(Ccls, 1))


# ----------------------------------------------------------------------------
# Host-side bilinear tables (grid_sample align_corners=False, zeros padding):
# 4 clamped corner indices + 4 weights per point; OOB corners get weight 0.
# ----------------------------------------------------------------------------
def _bilinear_tables(points, hf, wf):
    px = points[..., 0] * wf - 0.5
    py = points[..., 1] * hf - 0.5
    x0 = jnp.floor(px)
    y0 = jnp.floor(py)
    wx1 = px - x0
    wy1 = py - y0
    xs = (x0, x0 + 1.0)
    ys = (y0, y0 + 1.0)
    wxs = (1.0 - wx1, wx1)
    wys = (1.0 - wy1, wy1)
    idxs, wgts = [], []
    for iy in range(2):
        for ix in range(2):
            xc, yc = xs[ix], ys[iy]
            valid = (xc >= 0) & (xc < wf) & (yc >= 0) & (yc < hf)
            xi = jnp.clip(xc, 0, wf - 1).astype(jnp.int32)
            yi = jnp.clip(yc, 0, hf - 1).astype(jnp.int32)
            idxs.append(yi * wf + xi)
            wgts.append(jnp.where(valid, wxs[ix] * wys[iy], 0.0))
    return jnp.stack(idxs, axis=-1), jnp.stack(wgts, axis=-1)      # (B, N, 4)


# ----------------------------------------------------------------------------
# PointRend forward: result = backbone(x); result.update(head(x, res2, coarse))
# ----------------------------------------------------------------------------
def pointrend_forward(x_nchw, params, point_key):
    B, Cin, H, W = x_nchw.shape
    Hc, Wc = H // 4, W // 4
    Cres2 = params["w_res2"].shape[0]
    Ccls = params["w_coarse"].shape[0]
    x = x_nchw.astype(jnp.float32)

    # ---- backbone: one fused pass over x, NCHW in / NCHW out ----
    hc_tile = _pick_hc_tile(Hc)
    res2, coarse = fused_backbone(x, params["w_res2"], params["b_res2"],
                                  params["w_coarse"], params["b_coarse"],
                                  hc_tile)
    result = {"res2": res2, "coarse": coarse}

    # ---- point head ----
    # TODO(synk): uncertainty-based importance point sampling (top-k over an
    # over-generated point set) is omitted; deterministic uniform random points
    # are used instead.
    num_points = (H * W) // 16
    points = jax.random.uniform(point_key, (B, num_points, 2), dtype=jnp.float32)

    idx_c, wgt_c = _bilinear_tables(points, Hc, Wc)
    idx_f, wgt_f = _bilinear_tables(points, H, W)
    idx_all = jnp.concatenate([idx_c, idx_f], axis=-1).reshape(B, num_points * 8)
    wgt_all = jnp.concatenate([wgt_c, wgt_f], axis=-1).reshape(B, num_points * 8)

    # Channels-last flat copies so the in-kernel gather is a dynamic-sublane
    # row load (the safe/fast direction on TPU).
    # TODO(synk): at large H, W gather straight from the NCHW maps (or keep
    # them in HBM with a pipelined DMA gather) to avoid these two transposes.
    coarse_pts = coarse.reshape(B, Ccls, Hc * Wc).transpose(0, 2, 1)
    res2_pts = res2.reshape(B, Cres2, H * W).transpose(0, 2, 1)

    rend = point_head(idx_all, wgt_all, coarse_pts, res2_pts,
                      params["w_mlp_c"], params["w_mlp_f"], params["b_mlp"])
    result.update({"rend": rend, "points": points})
    return result


def reference_forward(x_nchw, params, point_key):
    """Pure-JAX reference with identical math, for a correctness check."""
    B, Cin, H, W = x_nchw.shape
    Hc, Wc = H // 4, W // 4
    Cres2 = params["w_res2"].shape[0]
    Ccls = params["w_coarse"].shape[0]
    x = x_nchw.astype(jnp.float32)

    res2 = jnp.maximum(
        jnp.einsum("oc,bchw->bohw", params["w_res2"], x)
        + params["b_res2"][None, :, None, None], 0.0)
    pooled = x.reshape(B, Cin, Hc, 4, Wc, 4).mean(axis=(3, 5))
    coarse = (jnp.einsum("oc,bchw->bohw", params["w_coarse"], pooled)
              + params["b_coarse"][None, :, None, None])

    N = (H * W) // 16
    points = jax.random.uniform(point_key, (B, N, 2), dtype=jnp.float32)
    idx_c, wgt_c = _bilinear_tables(points, Hc, Wc)
    idx_f, wgt_f = _bilinear_tables(points, H, W)

    coarse_pts = coarse.reshape(B, Ccls, Hc * Wc).transpose(0, 2, 1)
    res2_pts = res2.reshape(B, Cres2, H * W).transpose(0, 2, 1)
    gc = jnp.take_along_axis(coarse_pts, idx_c.reshape(B, N * 4, 1),
                             axis=1).reshape(B, N, 4, Ccls)
    gf = jnp.take_along_axis(res2_pts, idx_f.reshape(B, N * 4, 1),
                             axis=1).reshape(B, N, 4, Cres2)
    cs = (wgt_c[..., None] * gc).sum(axis=2)
    fs = (wgt_f[..., None] * gf).sum(axis=2)
    rend = (jnp.einsum("ok,bnk->bon", params["w_mlp_c"], cs)
            + jnp.einsum("ok,bnk->bon", params["w_mlp_f"], fs)
            + params["b_mlp"][None, :, None])
    return {"res2": res2, "coarse": coarse, "rend": rend, "points": points}


def init_params(key, c_in=4, c_res2=8, num_classes=3):
    ks = jax.random.split(key, 6)
    return {
        # 1x1 Conv2d weights, PyTorch (out, in) layout.
        "w_res2": 0.1 * jax.random.normal(ks[0], (c_res2, c_in), jnp.float32),
        "b_res2": 0.05 * jax.random.normal(ks[1], (c_res2,), jnp.float32),
        "w_coarse": 0.1 * jax.random.normal(ks[2], (num_classes, c_in), jnp.float32),
        "b_coarse": 0.05 * jax.random.normal(ks[3], (num_classes,), jnp.float32),
        # Conv1d(num_classes + c_res2 -> num_classes, k=1), split into the
        # coarse-feature and fine-feature halves of the weight.
        "w_mlp_c": 0.1 * jax.random.normal(ks[4], (num_classes, num_classes), jnp.float32),
        "w_mlp_f": 0.1 * jax.random.normal(ks[5], (num_classes, c_res2), jnp.float32),
        "b_mlp": jnp.zeros((num_classes,), jnp.float32),
    }


if __name__ == "__main__":
    key = jax.random.PRNGKey(0)
    k_x, k_param, k_pts = jax.random.split(key, 3)

    B, C, H, W = 2, 4, 16, 16
    x = jax.random.normal(k_x, (B, C, H, W), jnp.float32)
    params = init_params(k_param, c_in=C, c_res2=8, num_classes=3)

    out = pointrend_forward(x, params, k_pts)
    out = jax.tree_util.tree_map(jax.block_until_ready, out)

    ref = reference_forward(x, params, k_pts)
    for name in ("res2", "coarse", "rend", "points"):
        assert out[name].shape == ref[name].shape, name
        assert jnp.allclose(out[name], ref[name], atol=2e-4, rtol=2e-4), name

    print("KERNEL_OK")
</pallas_src>

<mosaic_0001>
module attributes {stable_mosaic.version = 11 : i64} {
  func.func @_backbone_kernel(%arg0: i32, %arg1: i32, %arg2: memref<1x4x16x16xf32, #tpu.memory_space<vmem>>, %arg3: memref<8x4xf32, #tpu.memory_space<smem>>, %arg4: memref<8x1xf32, #tpu.memory_space<smem>>, %arg5: memref<3x4xf32, #tpu.memory_space<smem>>, %arg6: memref<3x1xf32, #tpu.memory_space<smem>>, %arg7: memref<4x16xf32, #tpu.memory_space<vmem>>, %arg8: memref<16x4xf32, #tpu.memory_space<vmem>>, %arg9: memref<1x8x16x16xf32, #tpu.memory_space<vmem>>, %arg10: memref<1x3x4x4xf32, #tpu.memory_space<vmem>>) attributes {dimension_semantics = [#tpu.dimension_semantics<parallel>, #tpu.dimension_semantics<parallel>], iteration_bounds = array<i64: 2, 1>, scalar_prefetch = 0 : i64, scratch_operands = 0 : i64, tpu.core_type = #tpu.core_type<tc>, window_params = [{transform_indices = @transform_0, window_bounds = array<i64: 1, 4, 16, 16>}, {transform_indices = @transform_1, window_bounds = array<i64: 8, 4>}, {transform_indices = @transform_2, window_bounds = array<i64: 8, 1>}, {transform_indices = @transform_3, window_bounds = array<i64: 3, 4>}, {transform_indices = @transform_4, window_bounds = array<i64: 3, 1>}, {pipeline_mode = #tpu.pipeline_mode<synchronous>, transform_indices = @transform_5, window_bounds = array<i64: 4, 16>}, {pipeline_mode = #tpu.pipeline_mode<synchronous>, transform_indices = @transform_6, window_bounds = array<i64: 16, 4>}, {transform_indices = @transform_7, window_bounds = array<i64: 1, 8, 16, 16>}, {transform_indices = @transform_8, window_bounds = array<i64: 1, 3, 4, 4>}]} {
    %c0 = arith.constant 0 : index
    %c0_0 = arith.constant 0 : index
    %c0_1 = arith.constant 0 : index
    %c0_2 = arith.constant 0 : index
    %0 = vector.load %arg2[%c0, %c0_0, %c0_1, %c0_2] : memref<1x4x16x16xf32, #tpu.memory_space<vmem>>, vector<1x1x16x16xf32>
    %1 = vector.shape_cast %0 : vector<1x1x16x16xf32> to vector<16x16xf32>
    %c0_3 = arith.constant 0 : index
    %c1 = arith.constant 1 : index
    %c0_4 = arith.constant 0 : index
    %c0_5 = arith.constant 0 : index
    %2 = vector.load %arg2[%c0_3, %c1, %c0_4, %c0_5] : memref<1x4x16x16xf32, #tpu.memory_space<vmem>>, vector<1x1x16x16xf32>
    %3 = vector.shape_cast %2 : vector<1x1x16x16xf32> to vector<16x16xf32>
    %c0_6 = arith.constant 0 : index
    %c2 = arith.constant 2 : index
    %c0_7 = arith.constant 0 : index
    %c0_8 = arith.constant 0 : index
    %4 = vector.load %arg2[%c0_6, %c2, %c0_7, %c0_8] : memref<1x4x16x16xf32, #tpu.memory_space<vmem>>, vector<1x1x16x16xf32>
    %5 = vector.shape_cast %4 : vector<1x1x16x16xf32> to vector<16x16xf32>
    %c0_9 = arith.constant 0 : index
    %c3 = arith.constant 3 : index
    %c0_10 = arith.constant 0 : index
    %c0_11 = arith.constant 0 : index
    %6 = vector.load %arg2[%c0_9, %c3, %c0_10, %c0_11] : memref<1x4x16x16xf32, #tpu.memory_space<vmem>>, vector<1x1x16x16xf32>
    %7 = vector.shape_cast %6 : vector<1x1x16x16xf32> to vector<16x16xf32>
    %c0_12 = arith.constant 0 : index
    %c0_13 = arith.constant 0 : index
    %8 = memref.load %arg3[%c0_12, %c0_13] : memref<8x4xf32, #tpu.memory_space<smem>>
    %9 = vector.broadcast %8 : f32 to vector<16x16xf32>
    %10 = arith.mulf %9, %1 : vector<16x16xf32>
    %c0_14 = arith.constant 0 : index
    %c1_15 = arith.constant 1 : index
    %11 = memref.load %arg3[%c0_14, %c1_15] : memref<8x4xf32, #tpu.memory_space<smem>>
    %12 = vector.broadcast %11 : f32 to vector<16x16xf32>
    %13 = arith.mulf %12, %3 : vector<16x16xf32>
    %14 = arith.addf %10, %13 : vector<16x16xf32>
    %c0_16 = arith.constant 0 : index
    %c2_17 = arith.constant 2 : index
    %15 = memref.load %arg3[%c0_16, %c2_17] : memref<8x4xf32, #tpu.memory_space<smem>>
    %16 = vector.broadcast %15 : f32 to vector<16x16xf32>
    %17 = arith.mulf %16, %5 : vector<16x16xf32>
    %18 = arith.addf %14, %17 : vector<16x16xf32>
    %c0_18 = arith.constant 0 : index
    %c3_19 = arith.constant 3 : index
    %19 = memref.load %arg3[%c0_18, %c3_19] : memref<8x4xf32, #tpu.memory_space<smem>>
    %20 = vector.broadcast %19 : f32 to vector<16x16xf32>
    %21 = arith.mulf %20, %7 : vector<16x16xf32>
    %22 = arith.addf %18, %21 : vector<16x16xf32>
    %c0_20 = arith.constant 0 : index
    %c0_21 = arith.constant 0 : index
    %23 = memref.load %arg4[%c0_20, %c0_21] : memref<8x1xf32, #tpu.memory_space<smem>>
    %24 = vector.broadcast %23 : f32 to vector<16x16xf32>
    %25 = arith.addf %22, %24 : vector<16x16xf32>
    %cst = arith.constant 0.000000e+00 : f32
    %26 = vector.broadcast %cst : f32 to vector<16x16xf32>
    %27 = arith.maximumf %25, %26 : vector<16x16xf32>
    %c0_22 = arith.constant 0 : index
    %c0_23 = arith.constant 0 : index
    %c0_24 = arith.constant 0 : index
    %c0_25 = arith.constant 0 : index
    %28 = vector.load %arg9[%c0_22, %c0_23, %c0_24, %c0_25] : memref<1x8x16x16xf32, #tpu.memory_space<vmem>>, vector<1x1x16x16xf32>
    %29 = vector.shape_cast %28 : vector<1x1x16x16xf32> to vector<16x16xf32>
    %30 = vector.shape_cast %27 : vector<16x16xf32> to vector<1x1x16x16xf32>
    tpu.vector_store %arg9[%c0_22, %c0_23, %c0_24, %c0_25], %30 {strides = array<i32>} : memref<1x8x16x16xf32, #tpu.memory_space<vmem>>, vector<1x1x16x16xf32>,
    %c1_26 = arith.constant 1 : index
    %c0_27 = arith.constant 0 : index
    %31 = memref.load %arg3[%c1_26, %c0_27] : memref<8x4xf32, #tpu.memory_space<smem>>
    %32 = vector.broadcast %31 : f32 to vector<16x16xf32>
    %33 = arith.mulf %32, %1 : vector<16x16xf32>
    %c1_28 = arith.constant 1 : index
    %c1_29 = arith.constant 1 : index
    %34 = memref.load %arg3[%c1_28, %c1_29] : memref<8x4xf32, #tpu.memory_space<smem>>
    %35 = vector.broadcast %34 : f32 to vector<16x16xf32>
    %36 = arith.mulf %35, %3 : vector<16x16xf32>
    %37 = arith.addf %33, %36 : vector<16x16xf32>
    %c1_30 = arith.constant 1 : index
    %c2_31 = arith.constant 2 : index
    %38 = memref.load %arg3[%c1_30, %c2_31] : memref<8x4xf32, #tpu.memory_space<smem>>
    %39 = vector.broadcast %38 : f32 to vector<16x16xf32>
    %40 = arith.mulf %39, %5 : vector<16x16xf32>
    %41 = arith.addf %37, %40 : vector<16x16xf32>
    %c1_32 = arith.constant 1 : index
    %c3_33 = arith.constant 3 : index
    %42 = memref.load %arg3[%c1_32, %c3_33] : memref<8x4xf32, #tpu.memory_space<smem>>
    %43 = vector.broadcast %42 : f32 to vector<16x16xf32>
    %44 = arith.mulf %43, %7 : vector<16x16xf32>
    %45 = arith.addf %41, %44 : vector<16x16xf32>
    %c1_34 = arith.constant 1 : index
    %c0_35 = arith.constant 0 : index
    %46 = memref.load %arg4[%c1_34, %c0_35] : memref<8x1xf32, #tpu.memory_space<smem>>
    %47 = vector.broadcast %46 : f32 to vector<16x16xf32>
    %48 = arith.addf %45, %47 : vector<16x16xf32>
    %cst_36 = arith.constant 0.000000e+00 : f32
    %49 = vector.broadcast %cst_36 : f32 to vector<16x16xf32>
    %50 = arith.maximumf %48, %49 : vector<16x16xf32>
    %c0_37 = arith.constant 0 : index
    %c1_38 = arith.constant 1 : index
    %c0_39 = arith.constant 0 : index
    %c0_40 = arith.constant 0 : index
    %51 = vector.load %arg9[%c0_37, %c1_38, %c0_39, %c0_40] : memref<1x8x16x16xf32, #tpu.memory_space<vmem>>, vector<1x1x16x16xf32>
    %52 = vector.shape_cast %51 : vector<1x1x16x16xf32> to vector<16x16xf32>
    %53 = vector.shape_cast %50 : vector<16x16xf32> to vector<1x1x16x16xf32>
    tpu.vector_store %arg9[%c0_37, %c1_38, %c0_39, %c0_40], %53 {strides = array<i32>} : memref<1x8x16x16xf32, #tpu.memory_space<vmem>>, vector<1x1x16x16xf32>,
    %c2_41 = arith.constant 2 : index
    %c0_42 = arith.constant 0 : index
    %54 = memref.load %arg3[%c2_41, %c0_42] : memref<8x4xf32, #tpu.memory_space<smem>>
    %55 = vector.broadcast %54 : f32 to vector<16x16xf32>
    %56 = arith.mulf %55, %1 : vector<16x16xf32>
    %c2_43 = arith.constant 2 : index
    %c1_44 = arith.constant 1 : index
    %57 = memref.load %arg3[%c2_43, %c1_44] : memref<8x4xf32, #tpu.memory_space<smem>>
    %58 = vector.broadcast %57 : f32 to vector<16x16xf32>
    %59 = arith.mulf %58, %3 : vector<16x16xf32>
    %60 = arith.addf %56, %59 : vector<16x16xf32>
    %c2_45 = arith.constant 2 : index
    %c2_46 = arith.constant 2 : index
    %61 = memref.load %arg3[%c2_45, %c2_46] : memref<8x4xf32, #tpu.memory_space<smem>>
    %62 = vector.broadcast %61 : f32 to vector<16x16xf32>
    %63 = arith.mulf %62, %5 : vector<16x16xf32>
    %64 = arith.addf %60, %63 : vector<16x16xf32>
    %c2_47 = arith.constant 2 : index
    %c3_48 = arith.constant 3 : index
    %65 = memref.load %arg3[%c2_47, %c3_48] : memref<8x4xf32, #tpu.memory_space<smem>>
    %66 = vector.broadcast %65 : f32 to vector<16x16xf32>
    %67 = arith.mulf %66, %7 : vector<16x16xf32>
    %68 = arith.addf %64, %67 : vector<16x16xf32>
    %c2_49 = arith.constant 2 : index
    %c0_50 = arith.constant 0 : index
    %69 = memref.load %arg4[%c2_49, %c0_50] : memref<8x1xf32, #tpu.memory_space<smem>>
    %70 = vector.broadcast %69 : f32 to vector<16x16xf32>
    %71 = arith.addf %68, %70 : vector<16x16xf32>
    %cst_51 = arith.constant 0.000000e+00 : f32
    %72 = vector.broadcast %cst_51 : f32 to vector<16x16xf32>
    %73 = arith.maximumf %71, %72 : vector<16x16xf32>
    %c0_52 = arith.constant 0 : index
    %c2_53 = arith.constant 2 : index
    %c0_54 = arith.constant 0 : index
    %c0_55 = arith.constant 0 : index
    %74 = vector.load %arg9[%c0_52, %c2_53, %c0_54, %c0_55] : memref<1x8x16x16xf32, #tpu.memory_space<vmem>>, vector<1x1x16x16xf32>
    %75 = vector.shape_cast %74 : vector<1x1x16x16xf32> to vector<16x16xf32>
    %76 = vector.shape_cast %73 : vector<16x16xf32> to vector<1x1x16x16xf32>
    tpu.vector_store %arg9[%c0_52, %c2_53, %c0_54, %c0_55], %76 {strides = array<i32>} : memref<1x8x16x16xf32, #tpu.memory_space<vmem>>, vector<1x1x16x16xf32>,
    %c3_56 = arith.constant 3 : index
    %c0_57 = arith.constant 0 : index
    %77 = memref.load %arg3[%c3_56, %c0_57] : memref<8x4xf32, #tpu.memory_space<smem>>
    %78 = vector.broadcast %77 : f32 to vector<16x16xf32>
    %79 = arith.mulf %78, %1 : vector<16x16xf32>
    %c3_58 = arith.constant 3 : index
    %c1_59 = arith.constant 1 : index
    %80 = memref.load %arg3[%c3_58, %c1_59] : memref<8x4xf32, #tpu.memory_space<smem>>
    %81 = vector.broadcast %80 : f32 to vector<16x16xf32>
    %82 = arith.mulf %81, %3 : vector<16x16xf32>
    %83 = arith.addf %79, %82 : vector<16x16xf32>
    %c3_60 = arith.constant 3 : index
    %c2_61 = arith.constant 2 : index
    %84 = memref.load %arg3[%c3_60, %c2_61] : memref<8x4xf32, #tpu.memory_space<smem>>
    %85 = vector.broadcast %84 : f32 to vector<16x16xf32>
    %86 = arith.mulf %85, %5 : vector<16x16xf32>
    %87 = arith.addf %83, %86 : vector<16x16xf32>
    %c3_62 = arith.constant 3 : index
    %c3_63 = arith.constant 3 : index
    %88 = memref.load %arg3[%c3_62, %c3_63] : memref<8x4xf32, #tpu.memory_space<smem>>
    %89 = vector.broadcast %88 : f32 to vector<16x16xf32>
    %90 = arith.mulf %89, %7 : vector<16x16xf32>
    %91 = arith.addf %87, %90 : vector<16x16xf32>
    %c3_64 = arith.constant 3 : index
    %c0_65 = arith.constant 0 : index
    %92 = memref.load %arg4[%c3_64, %c0_65] : memref<8x1xf32, #tpu.memory_space<smem>>
    %93 = vector.broadcast %92 : f32 to vector<16x16xf32>
    %94 = arith.addf %91, %93 : vector<16x16xf32>
    %cst_66 = arith.constant 0.000000e+00 : f32
    %95 = vector.broadcast %cst_66 : f32 to vector<16x16xf32>
    %96 = arith.maximumf %94, %95 : vector<16x16xf32>
    %c0_67 = arith.constant 0 : index
    %c3_68 = arith.constant 3 : index
    %c0_69 = arith.constant 0 : index
    %c0_70 = arith.constant 0 : index
    %97 = vector.load %arg9[%c0_67, %c3_68, %c0_69, %c0_70] : memref<1x8x16x16xf32, #tpu.memory_space<vmem>>, vector<1x1x16x16xf32>
    %98 = vector.shape_cast %97 : vector<1x1x16x16xf32> to vector<16x16xf32>
    %99 = vector.shape_cast %96 : vector<16x16xf32> to vector<1x1x16x16xf32>
    tpu.vector_store %arg9[%c0_67, %c3_68, %c0_69, %c0_70], %99 {strides = array<i32>} : memref<1x8x16x16xf32, #tpu.memory_space<vmem>>, vector<1x1x16x16xf32>,
    %c4 = arith.constant 4 : index
    %c0_71 = arith.constant 0 : index
    %100 = memref.load %arg3[%c4, %c0_71] : memref<8x4xf32, #tpu.memory_space<smem>>
    %101 = vector.broadcast %100 : f32 to vector<16x16xf32>
    %102 = arith.mulf %101, %1 : vector<16x16xf32>
    %c4_72 = arith.constant 4 : index
    %c1_73 = arith.constant 1 : index
    %103 = memref.load %arg3[%c4_72, %c1_73] : memref<8x4xf32, #tpu.memory_space<smem>>
    %104 = vector.broadcast %103 : f32 to vector<16x16xf32>
    %105 = arith.mulf %104, %3 : vector<16x16xf32>
    %106 = arith.addf %102, %105 : vector<16x16xf32>
    %c4_74 = arith.constant 4 : index
    %c2_75 = arith.constant 2 : index
    %107 = memref.load %arg3[%c4_74, %c2_75] : memref<8x4xf32, #tpu.memory_space<smem>>
    %108 = vector.broadcast %107 : f32 to vector<16x16xf32>
    %109 = arith.mulf %108, %5 : vector<16x16xf32>
    %110 = arith.addf %106, %109 : vector<16x16xf32>
    %c4_76 = arith.constant 4 : index
    %c3_77 = arith.constant 3 : index
    %111 = memref.load %arg3[%c4_76, %c3_77] : memref<8x4xf32, #tpu.memory_space<smem>>
    %112 = vector.broadcast %111 : f32 to vector<16x16xf32>
    %113 = arith.mulf %112, %7 : vector<16x16xf32>
    %114 = arith.addf %110, %113 : vector<16x16xf32>
    %c4_78 = arith.constant 4 : index
    %c0_79 = arith.constant 0 : index
    %115 = memref.load %arg4[%c4_78, %c0_79] : memref<8x1xf32, #tpu.memory_space<smem>>
    %116 = vector.broadcast %115 : f32 to vector<16x16xf32>
    %117 = arith.addf %114, %116 : vector<16x16xf32>
    %cst_80 = arith.constant 0.000000e+00 : f32
    %118 = vector.broadcast %cst_80 : f32 to vector<16x16xf32>
    %119 = arith.maximumf %117, %118 : vector<16x16xf32>
    %c0_81 = arith.constant 0 : index
    %c4_82 = arith.constant 4 : index
    %c0_83 = arith.constant 0 : index
    %c0_84 = arith.constant 0 : index
    %120 = vector.load %arg9[%c0_81, %c4_82, %c0_83, %c0_84] : memref<1x8x16x16xf32, #tpu.memory_space<vmem>>, vector<1x1x16x16xf32>
    %121 = vector.shape_cast %120 : vector<1x1x16x16xf32> to vector<16x16xf32>
    %122 = vector.shape_cast %119 : vector<16x16xf32> to vector<1x1x16x16xf32>
    tpu.vector_store %arg9[%c0_81, %c4_82, %c0_83, %c0_84], %122 {strides = array<i32>} : memref<1x8x16x16xf32, #tpu.memory_space<vmem>>, vector<1x1x16x16xf32>,
    %c5 = arith.constant 5 : index
    %c0_85 = arith.constant 0 : index
    %123 = memref.load %arg3[%c5, %c0_85] : memref<8x4xf32, #tpu.memory_space<smem>>
    %124 = vector.broadcast %123 : f32 to vector<16x16xf32>
    %125 = arith.mulf %124, %1 : vector<16x16xf32>
    %c5_86 = arith.constant 5 : index
    %c1_87 = arith.constant 1 : index
    %126 = memref.load %arg3[%c5_86, %c1_87] : memref<8x4xf32, #tpu.memory_space<smem>>
    %127 = vector.broadcast %126 : f32 to vector<16x16xf32>
    %128 = arith.mulf %127, %3 : vector<16x16xf32>
    %129 = arith.addf %125, %128 : vector<16x16xf32>
    %c5_88 = arith.constant 5 : index
    %c2_89 = arith.constant 2 : index
    %130 = memref.load %arg3[%c5_88, %c2_89] : memref<8x4xf32, #tpu.memory_space<smem>>
    %131 = vector.broadcast %130 : f32 to vector<16x16xf32>
    %132 = arith.mulf %131, %5 : vector<16x16xf32>
    %133 = arith.addf %129, %132 : vector<16x16xf32>
    %c5_90 = arith.constant 5 : index
    %c3_91 = arith.constant 3 : index
    %134 = memref.load %arg3[%c5_90, %c3_91] : memref<8x4xf32, #tpu.memory_space<smem>>
    %135 = vector.broadcast %134 : f32 to vector<16x16xf32>
    %136 = arith.mulf %135, %7 : vector<16x16xf32>
    %137 = arith.addf %133, %136 : vector<16x16xf32>
    %c5_92 = arith.constant 5 : index
    %c0_93 = arith.constant 0 : index
    %138 = memref.load %arg4[%c5_92, %c0_93] : memref<8x1xf32, #tpu.memory_space<smem>>
    %139 = vector.broadcast %138 : f32 to vector<16x16xf32>
    %140 = arith.addf %137, %139 : vector<16x16xf32>
    %cst_94 = arith.constant 0.000000e+00 : f32
    %141 = vector.broadcast %cst_94 : f32 to vector<16x16xf32>
    %142 = arith.maximumf %140, %141 : vector<16x16xf32>
    %c0_95 = arith.constant 0 : index
    %c5_96 = arith.constant 5 : index
    %c0_97 = arith.constant 0 : index
    %c0_98 = arith.constant 0 : index
    %143 = vector.load %arg9[%c0_95, %c5_96, %c0_97, %c0_98] : memref<1x8x16x16xf32, #tpu.memory_space<vmem>>, vector<1x1x16x16xf32>
    %144 = vector.shape_cast %143 : vector<1x1x16x16xf32> to vector<16x16xf32>
    %145 = vector.shape_cast %142 : vector<16x16xf32> to vector<1x1x16x16xf32>
    tpu.vector_store %arg9[%c0_95, %c5_96, %c0_97, %c0_98], %145 {strides = array<i32>} : memref<1x8x16x16xf32, #tpu.memory_space<vmem>>, vector<1x1x16x16xf32>,
    %c6 = arith.constant 6 : index
    %c0_99 = arith.constant 0 : index
    %146 = memref.load %arg3[%c6, %c0_99] : memref<8x4xf32, #tpu.memory_space<smem>>
    %147 = vector.broadcast %146 : f32 to vector<16x16xf32>
    %148 = arith.mulf %147, %1 : vector<16x16xf32>
    %c6_100 = arith.constant 6 : index
    %c1_101 = arith.constant 1 : index
    %149 = memref.load %arg3[%c6_100, %c1_101] : memref<8x4xf32, #tpu.memory_space<smem>>
    %150 = vector.broadcast %149 : f32 to vector<16x16xf32>
    %151 = arith.mulf %150, %3 : vector<16x16xf32>
    %152 = arith.addf %148, %151 : vector<16x16xf32>
    %c6_102 = arith.constant 6 : index
    %c2_103 = arith.constant 2 : index
    %153 = memref.load %arg3[%c6_102, %c2_103] : memref<8x4xf32, #tpu.memory_space<smem>>
    %154 = vector.broadcast %153 : f32 to vector<16x16xf32>
    %155 = arith.mulf %154, %5 : vector<16x16xf32>
    %156 = arith.addf %152, %155 : vector<16x16xf32>
    %c6_104 = arith.constant 6 : index
    %c3_105 = arith.constant 3 : index
    %157 = memref.load %arg3[%c6_104, %c3_105] : memref<8x4xf32, #tpu.memory_space<smem>>
    %158 = vector.broadcast %157 : f32 to vector<16x16xf32>
    %159 = arith.mulf %158, %7 : vector<16x16xf32>
    %160 = arith.addf %156, %159 : vector<16x16xf32>
    %c6_106 = arith.constant 6 : index
    %c0_107 = arith.constant 0 : index
    %161 = memref.load %arg4[%c6_106, %c0_107] : memref<8x1xf32, #tpu.memory_space<smem>>
    %162 = vector.broadcast %161 : f32 to vector<16x16xf32>
    %163 = arith.addf %160, %162 : vector<16x16xf32>
    %cst_108 = arith.constant 0.000000e+00 : f32
    %164 = vector.broadcast %cst_108 : f32 to vector<16x16xf32>
    %165 = arith.maximumf %163, %164 : vector<16x16xf32>
    %c0_109 = arith.constant 0 : index
    %c6_110 = arith.constant 6 : index
    %c0_111 = arith.constant 0 : index
    %c0_112 = arith.constant 0 : index
    %166 = vector.load %arg9[%c0_109, %c6_110, %c0_111, %c0_112] : memref<1x8x16x16xf32, #tpu.memory_space<vmem>>, vector<1x1x16x16xf32>
    %167 = vector.shape_cast %166 : vector<1x1x16x16xf32> to vector<16x16xf32>
    %168 = vector.shape_cast %165 : vector<16x16xf32> to vector<1x1x16x16xf32>
    tpu.vector_store %arg9[%c0_109, %c6_110, %c0_111, %c0_112], %168 {strides = array<i32>} : memref<1x8x16x16xf32, #tpu.memory_space<vmem>>, vector<1x1x16x16xf32>,
    %c7 = arith.constant 7 : index
    %c0_113 = arith.constant 0 : index
    %169 = memref.load %arg3[%c7, %c0_113] : memref<8x4xf32, #tpu.memory_space<smem>>
    %170 = vector.broadcast %169 : f32 to vector<16x16xf32>
    %171 = arith.mulf %170, %1 : vector<16x16xf32>
    %c7_114 = arith.constant 7 : index
    %c1_115 = arith.constant 1 : index
    %172 = memref.load %arg3[%c7_114, %c1_115] : memref<8x4xf32, #tpu.memory_space<smem>>
    %173 = vector.broadcast %172 : f32 to vector<16x16xf32>
    %174 = arith.mulf %173, %3 : vector<16x16xf32>
    %175 = arith.addf %171, %174 : vector<16x16xf32>
    %c7_116 = arith.constant 7 : index
    %c2_117 = arith.constant 2 : index
    %176 = memref.load %arg3[%c7_116, %c2_117] : memref<8x4xf32, #tpu.memory_space<smem>>
    %177 = vector.broadcast %176 : f32 to vector<16x16xf32>
    %178 = arith.mulf %177, %5 : vector<16x16xf32>
    %179 = arith.addf %175, %178 : vector<16x16xf32>
    %c7_118 = arith.constant 7 : index
    %c3_119 = arith.constant 3 : index
    %180 = memref.load %arg3[%c7_118, %c3_119] : memref<8x4xf32, #tpu.memory_space<smem>>
    %181 = vector.broadcast %180 : f32 to vector<16x16xf32>
    %182 = arith.mulf %181, %7 : vector<16x16xf32>
    %183 = arith.addf %179, %182 : vector<16x16xf32>
    %c7_120 = arith.constant 7 : index
    %c0_121 = arith.constant 0 : index
    %184 = memref.load %arg4[%c7_120, %c0_121] : memref<8x1xf32, #tpu.memory_space<smem>>
    %185 = vector.broadcast %184 : f32 to vector<16x16xf32>
    %186 = arith.addf %183, %185 : vector<16x16xf32>
    %cst_122 = arith.constant 0.000000e+00 : f32
    %187 = vector.broadcast %cst_122 : f32 to vector<16x16xf32>
    %188 = arith.maximumf %186, %187 : vector<16x16xf32>
    %c0_123 = arith.constant 0 : index
    %c7_124 = arith.constant 7 : index
    %c0_125 = arith.constant 0 : index
    %c0_126 = arith.constant 0 : index
    %189 = vector.load %arg9[%c0_123, %c7_124, %c0_125, %c0_126] : memref<1x8x16x16xf32, #tpu.memory_space<vmem>>, vector<1x1x16x16xf32>
    %190 = vector.shape_cast %189 : vector<1x1x16x16xf32> to vector<16x16xf32>
    %191 = vector.shape_cast %188 : vector<16x16xf32> to vector<1x1x16x16xf32>
    tpu.vector_store %arg9[%c0_123, %c7_124, %c0_125, %c0_126], %191 {strides = array<i32>} : memref<1x8x16x16xf32, #tpu.memory_space<vmem>>, vector<1x1x16x16xf32>,
    %c0_127 = arith.constant 0 : index
    %c0_128 = arith.constant 0 : index
    %192 = vector.load %arg7[%c0_127, %c0_128] : memref<4x16xf32, #tpu.memory_space<vmem>>, vector<4x16xf32>
    %c0_129 = arith.constant 0 : index
    %c0_130 = arith.constant 0 : index
    %193 = vector.load %arg8[%c0_129, %c0_130] : memref<16x4xf32, #tpu.memory_space<vmem>>, vector<16x4xf32>
    %cst_131 = arith.constant dense<0.000000e+00> : vector<4x16xf32>
    %194 = tpu.matmul %192, %1, %cst_131 {dimension_numbers = #tpu.dot_dimension_numbers<[1], [0], [0], [1], [0, 0, 1, 1], [], []>} : vector<4x16xf32>, vector<16x16xf32>, vector<4x16xf32> -> vector<4x16xf32>
    %cst_132 = arith.constant dense<0.000000e+00> : vector<4x4xf32>
    %195 = tpu.matmul %194, %193, %cst_132 {dimension_numbers = #tpu.dot_dimension_numbers<[1], [0], [0], [1], [0, 0, 1, 1], [], []>} : vector<4x16xf32>, vector<16x4xf32>, vector<4x4xf32> -> vector<4x4xf32>
    %cst_133 = arith.constant dense<0.000000e+00> : vector<4x16xf32>
    %196 = tpu.matmul %192, %3, %cst_133 {dimension_numbers = #tpu.dot_dimension_numbers<[1], [0], [0], [1], [0, 0, 1, 1], [], []>} : vector<4x16xf32>, vector<16x16xf32>, vector<4x16xf32> -> vector<4x16xf32>
    %cst_134 = arith.constant dense<0.000000e+00> : vector<4x4xf32>
    %197 = tpu.matmul %196, %193, %cst_134 {dimension_numbers = #tpu.dot_dimension_numbers<[1], [0], [0], [1], [0, 0, 1, 1], [], []>} : vector<4x16xf32>, vector<16x4xf32>, vector<4x4xf32> -> vector<4x4xf32>
    %cst_135 = arith.constant dense<0.000000e+00> : vector<4x16xf32>
    %198 = tpu.matmul %192, %5, %cst_135 {dimension_numbers = #tpu.dot_dimension_numbers<[1], [0], [0], [1], [0, 0, 1, 1], [], []>} : vector<4x16xf32>, vector<16x16xf32>, vector<4x16xf32> -> vector<4x16xf32>
    %cst_136 = arith.constant dense<0.000000e+00> : vector<4x4xf32>
    %199 = tpu.matmul %198, %193, %cst_136 {dimension_numbers = #tpu.dot_dimension_numbers<[1], [0], [0], [1], [0, 0, 1, 1], [], []>} : vector<4x16xf32>, vector<16x4xf32>, vector<4x4xf32> -> vector<4x4xf32>
    %cst_137 = arith.constant dense<0.000000e+00> : vector<4x16xf32>
    %200 = tpu.matmul %192, %7, %cst_137 {dimension_numbers = #tpu.dot_dimension_numbers<[1], [0], [0], [1], [0, 0, 1, 1], [], []>} : vector<4x16xf32>, vector<16x16xf32>, vector<4x16xf32> -> vector<4x16xf32>
    %cst_138 = arith.constant dense<0.000000e+00> : vector<4x4xf32>
    %201 = tpu.matmul %200, %193, %cst_138 {dimension_numbers = #tpu.dot_dimension_numbers<[1], [0], [0], [1], [0, 0, 1, 1], [], []>} : vector<4x16xf32>, vector<16x4xf32>, vector<4x4xf32> -> vector<4x4xf32>
    %c0_139 = arith.constant 0 : index
    %c0_140 = arith.constant 0 : index
    %202 = memref.load %arg5[%c0_139, %c0_140] : memref<3x4xf32, #tpu.memory_space<smem>>
    %203 = vector.broadcast %202 : f32 to vector<4x4xf32>
    %204 = arith.mulf %203, %195 : vector<4x4xf32>
    %c0_141 = arith.constant 0 : index
    %c1_142 = arith.constant 1 : index
    %205 = memref.load %arg5[%c0_141, %c1_142] : memref<3x4xf32, #tpu.memory_space<smem>>
    %206 = vector.broadcast %205 : f32 to vector<4x4xf32>
    %207 = arith.mulf %206, %197 : vector<4x4xf32>
    %208 = arith.addf %204, %207 : vector<4x4xf32>
    %c0_143 = arith.constant 0 : index
    %c2_144 = arith.constant 2 : index
    %209 = memref.load %arg5[%c0_143, %c2_144] : memref<3x4xf32, #tpu.memory_space<smem>>
    %210 = vector.broadcast %209 : f32 to vector<4x4xf32>
    %211 = arith.mulf %210, %199 : vector<4x4xf32>
    %212 = arith.addf %208, %211 : vector<4x4xf32>
    %c0_145 = arith.constant 0 : index
    %c3_146 = arith.constant 3 : index
    %213 = memref.load %arg5[%c0_145, %c3_146] : memref<3x4xf32, #tpu.memory_space<smem>>
    %214 = vector.broadcast %213 : f32 to vector<4x4xf32>
    %215 = arith.mulf %214, %201 : vector<4x4xf32>
    %216 = arith.addf %212, %215 : vector<4x4xf32>
    %c0_147 = arith.constant 0 : index
    %c0_148 = arith.constant 0 : index
    %217 = memref.load %arg6[%c0_147, %c0_148] : memref<3x1xf32, #tpu.memory_space<smem>>
    %218 = vector.broadcast %217 : f32 to vector<4x4xf32>
    %219 = arith.addf %216, %218 : vector<4x4xf32>
    %c0_149 = arith.constant 0 : index
    %c0_150 = arith.constant 0 : index
    %c0_151 = arith.constant 0 : index
    %c0_152 = arith.constant 0 : index
    %220 = vector.load %arg10[%c0_149, %c0_150, %c0_151, %c0_152] : memref<1x3x4x4xf32, #tpu.memory_space<vmem>>, vector<1x1x4x4xf32>
    %221 = vector.shape_cast %220 : vector<1x1x4x4xf32> to vector<4x4xf32>
    %222 = vector.shape_cast %219 : vector<4x4xf32> to vector<1x1x4x4xf32>
    tpu.vector_store %arg10[%c0_149, %c0_150, %c0_151, %c0_152], %222 {strides = array<i32>} : memref<1x3x4x4xf32, #tpu.memory_space<vmem>>, vector<1x1x4x4xf32>,
    %c1_153 = arith.constant 1 : index
    %c0_154 = arith.constant 0 : index
    %223 = memref.load %arg5[%c1_153, %c0_154] : memref<3x4xf32, #tpu.memory_space<smem>>
    %224 = vector.broadcast %223 : f32 to vector<4x4xf32>
    %225 = arith.mulf %224, %195 : vector<4x4xf32>
    %c1_155 = arith.constant 1 : index
    %c1_156 = arith.constant 1 : index
    %226 = memref.load %arg5[%c1_155, %c1_156] : memref<3x4xf32, #tpu.memory_space<smem>>
    %227 = vector.broadcast %226 : f32 to vector<4x4xf32>
    %228 = arith.mulf %227, %197 : vector<4x4xf32>
    %229 = arith.addf %225, %228 : vector<4x4xf32>
    %c1_157 = arith.constant 1 : index
    %c2_158 = arith.constant 2 : index
    %230 = memref.load %arg5[%c1_157, %c2_158] : memref<3x4xf32, #tpu.memory_space<smem>>
    %231 = vector.broadcast %230 : f32 to vector<4x4xf32>
    %232 = arith.mulf %231, %199 : vector<4x4xf32>
    %233 = arith.addf %229, %232 : vector<4x4xf32>
    %c1_159 = arith.constant 1 : index
    %c3_160 = arith.constant 3 : index
    %234 = memref.load %arg5[%c1_159, %c3_160] : memref<3x4xf32, #tpu.memory_space<smem>>
    %235 = vector.broadcast %234 : f32 to vector<4x4xf32>
    %236 = arith.mulf %235, %201 : vector<4x4xf32>
    %237 = arith.addf %233, %236 : vector<4x4xf32>
    %c1_161 = arith.constant 1 : index
    %c0_162 = arith.constant 0 : index
    %238 = memref.load %arg6[%c1_161, %c0_162] : memref<3x1xf32, #tpu.memory_space<smem>>
    %239 = vector.broadcast %238 : f32 to vector<4x4xf32>
    %240 = arith.addf %237, %239 : vector<4x4xf32>
    %c0_163 = arith.constant 0 : index
    %c1_164 = arith.constant 1 : index
    %c0_165 = arith.constant 0 : index
    %c0_166 = arith.constant 0 : index
    %241 = vector.load %arg10[%c0_163, %c1_164, %c0_165, %c0_166] : memref<1x3x4x4xf32, #tpu.memory_space<vmem>>, vector<1x1x4x4xf32>
    %242 = vector.shape_cast %241 : vector<1x1x4x4xf32> to vector<4x4xf32>
    %243 = vector.shape_cast %240 : vector<4x4xf32> to vector<1x1x4x4xf32>
    tpu.vector_store %arg10[%c0_163, %c1_164, %c0_165, %c0_166], %243 {strides = array<i32>} : memref<1x3x4x4xf32, #tpu.memory_space<vmem>>, vector<1x1x4x4xf32>,
    %c2_167 = arith.constant 2 : index
    %c0_168 = arith.constant 0 : index
    %244 = memref.load %arg5[%c2_167, %c0_168] : memref<3x4xf32, #tpu.memory_space<smem>>
    %245 = vector.broadcast %244 : f32 to vector<4x4xf32>
    %246 = arith.mulf %245, %195 : vector<4x4xf32>
    %c2_169 = arith.constant 2 : index
    %c1_170 = arith.constant 1 : index
    %247 = memref.load %arg5[%c2_169, %c1_170] : memref<3x4xf32, #tpu.memory_space<smem>>
    %248 = vector.broadcast %247 : f32 to vector<4x4xf32>
    %249 = arith.mulf %248, %197 : vector<4x4xf32>
    %250 = arith.addf %246, %249 : vector<4x4xf32>
    %c2_171 = arith.constant 2 : index
    %c2_172 = arith.constant 2 : index
    %251 = memref.load %arg5[%c2_171, %c2_172] : memref<3x4xf32, #tpu.memory_space<smem>>
    %252 = vector.broadcast %251 : f32 to vector<4x4xf32>
    %253 = arith.mulf %252, %199 : vector<4x4xf32>
    %254 = arith.addf %250, %253 : vector<4x4xf32>
    %c2_173 = arith.constant 2 : index
    %c3_174 = arith.constant 3 : index
    %255 = memref.load %arg5[%c2_173, %c3_174] : memref<3x4xf32, #tpu.memory_space<smem>>
    %256 = vector.broadcast %255 : f32 to vector<4x4xf32>
    %257 = arith.mulf %256, %201 : vector<4x4xf32>
    %258 = arith.addf %254, %257 : vector<4x4xf32>
    %c2_175 = arith.constant 2 : index
    %c0_176 = arith.constant 0 : index
    %259 = memref.load %arg6[%c2_175, %c0_176] : memref<3x1xf32, #tpu.memory_space<smem>>
    %260 = vector.broadcast %259 : f32 to vector<4x4xf32>
    %261 = arith.addf %258, %260 : vector<4x4xf32>
    %c0_177 = arith.constant 0 : index
    %c2_178 = arith.constant 2 : index
    %c0_179 = arith.constant 0 : index
    %c0_180 = arith.constant 0 : index
    %262 = vector.load %arg10[%c0_177, %c2_178, %c0_179, %c0_180] : memref<1x3x4x4xf32, #tpu.memory_space<vmem>>, vector<1x1x4x4xf32>
    %263 = vector.shape_cast %262 : vector<1x1x4x4xf32> to vector<4x4xf32>
    %264 = vector.shape_cast %261 : vector<4x4xf32> to vector<1x1x4x4xf32>
    tpu.vector_store %arg10[%c0_177, %c2_178, %c0_179, %c0_180], %264 {strides = array<i32>} : memref<1x3x4x4xf32, #tpu.memory_space<vmem>>, vector<1x1x4x4xf32>,
    return
  }
  func.func @transform_0(%arg0: i32, %arg1: i32) -> (i32, i32, i32, i32) {
    %c0_i32 = arith.constant 0 : i32
    %c0_i32_0 = arith.constant 0 : i32
    %c0_i32_1 = arith.constant 0 : i32
    return %arg0, %c0_i32, %arg1, %c0_i32_0 : i32, i32, i32, i32
  }
  func.func @transform_1(%arg0: i32, %arg1: i32) -> (i32, i32) {
    %c0_i32 = arith.constant 0 : i32
    %c0_i32_0 = arith.constant 0 : i32
    %c0_i32_1 = arith.constant 0 : i32
    return %c0_i32, %c0_i32_0 : i32, i32
  }
  func.func @transform_2(%arg0: i32, %arg1: i32) -> (i32, i32) {
    %c0_i32 = arith.constant 0 : i32
    %c0_i32_0 = arith.constant 0 : i32
    %c0_i32_1 = arith.constant 0 : i32
    return %c0_i32, %c0_i32_0 : i32, i32
  }
  func.func @transform_3(%arg0: i32, %arg1: i32) -> (i32, i32) {
    %c0_i32 = arith.constant 0 : i32
    %c0_i32_0 = arith.constant 0 : i32
    %c0_i32_1 = arith.constant 0 : i32
    return %c0_i32, %c0_i32_0 : i32, i32
  }
  func.func @transform_4(%arg0: i32, %arg1: i32) -> (i32, i32) {
    %c0_i32 = arith.constant 0 : i32
    %c0_i32_0 = arith.constant 0 : i32
    %c0_i32_1 = arith.constant 0 : i32
    return %c0_i32, %c0_i32_0 : i32, i32
  }
  func.func @transform_5(%arg0: i32, %arg1: i32) -> (i32, i32) {
    %c0_i32 = arith.constant 0 : i32
    %c0_i32_0 = arith.constant 0 : i32
    %c0_i32_1 = arith.constant 0 : i32
    return %c0_i32, %c0_i32_0 : i32, i32
  }
  func.func @transform_6(%arg0: i32, %arg1: i32) -> (i32, i32) {
    %c0_i32 = arith.constant 0 : i32
    %c0_i32_0 = arith.constant 0 : i32
    %c0_i32_1 = arith.constant 0 : i32
    return %c0_i32, %c0_i32_0 : i32, i32
  }
  func.func @transform_7(%arg0: i32, %arg1: i32) -> (i32, i32, i32, i32) {
    %c0_i32 = arith.constant 0 : i32
    %c0_i32_0 = arith.constant 0 : i32
    %c0_i32_1 = arith.constant 0 : i32
    return %arg0, %c0_i32, %arg1, %c0_i32_0 : i32, i32, i32, i32
  }
  func.func @transform_8(%arg0: i32, %arg1: i32) -> (i32, i32, i32, i32) {
    %c0_i32 = arith.constant 0 : i32
    %c0_i32_0 = arith.constant 0 : i32
    %c0_i32_1 = arith.constant 0 : i32
    return %arg0, %c0_i32, %arg1, %c0_i32_0 : i32, i32, i32, i32
  }
}

</mosaic_0001>

<bundles_post_ra>
// kernel: tpu_custom_call.1
= control target key start
LH: loop header
LB: loop body
LE: loop exit
PB: predicated region body
PF: predicated region fallthrough
CT: control target
= control target key end

     0   :  { %s2725_s0 = inlined_call_operand.hbm [shape: f32[2,4,16,16], index: 0, kind: input, shape index: {}]   ;;  %s2726_s1 = inlined_call_operand.vmem [shape: f32[8,4], index: 1, kind: input, shape index: {}]   ;;  %s2727_s2 = inlined_call_operand.vmem [shape: f32[8,1], index: 2, kind: input, shape index: {}]   ;;  %s2728_s3 = inlined_call_operand.vmem [shape: f32[3,4], index: 3, kind: input, shape index: {}]   ;;  %s2729_s4 = inlined_call_operand.vmem [shape: f32[3,1], index: 4, kind: input, shape index: {}]   ;;  %s2730_s5 = inlined_call_operand.vmem [shape: f32[4,16], index: 5, kind: input, shape index: {}]   ;;  %s2731_s6 = inlined_call_operand.vmem [shape: f32[16,4], index: 6, kind: input, shape index: {}]   ;;  %s2732_s7 = inlined_call_operand.hbm [shape: f32[2,8,16,16], index: 7, kind: output, shape index: {0}]   ;;  %s2733_s8 = inlined_call_operand.hbm [shape: f32[2,3,4,4], index: 8, kind: output, shape index: {1}]  }
   0x1   :  { %2738 = sst [smem:[#allocation21_spill]] %s2726_s1 }
   0x2   :  { %2739 = sst [smem:[#allocation22_spill]] %s2727_s2 }
   0x3   :  { %2740 = sst [smem:[#allocation23_spill]] %s2728_s3 }
   0x4   :  { %2741 = sst [smem:[#allocation24_spill]] %s2729_s4 }
   0x5   :  { %14 = vsyncpa [#allocation3], 0 }
   0x6   :  { %16 = vsyncpa [#allocation3 + $0x1], 0 }
   0x7   :  { %17 = vsyncpa [#allocation5], 0 }
   0x8   :  { %18 = vsyncpa [#allocation8], 0 }
   0x9   :  { %19 = vsyncpa [#allocation11], 0 }
   0xa   :  { %20 = vsyncpa [#allocation4], 0 }
   0xb   :  { %22 = vsyncpa [#allocation4 + $0x1], 0 }
   0xc   :  { %23 = vsyncpa [#allocation14], 0 }
   0xd   :  { %25 = vsyncpa [#allocation14 + $0x1], 0  ;;  %s2083_s27 = smov 0   ;;  %s2085_s28 = smov 0  }
   0xe   :  { %s2087_s29 = smov 0   ;;  %s2089_s30 = smov 0  }
   0xf   :  { %s2091_s9 = smov 0   ;;  %s2093_s10 = smov 0  }
  0x10 LB: > { %s1506_s11 = sadd.s32 4294967295, %s2021_s10   ;;  %s1507_s12 = sadd.s32 4294967294, %s2021_s10   ;;  %s2021_s10 = sphi %s2093_s10, %s31_s10   ;;  %s2017_s9 = sphi %s2091_s9, %s2764_s9   ;;  %s2013_s30 = sphi %s2089_s30, %s2763_s30   ;;  %s2009_s29 = sphi %s2087_s29, %s2762_s29   ;;  %s2005_s28 = sphi %s2085_s28, %s2761_s28   ;;  %s2001_s27 = sphi %s2083_s27, %s2760_s27  }
  0x11   : > { %p65_p0 = scmp.ne.s32.totalorder %s2005_s28, %s2001_s27  ;;  %p2117_p1 = scmp.eq.s32.totalorder %s1506_s11, 0 }
  0x12   : > { %p2121_p2 = scmp.eq.s32.totalorder %s1506_s11, 1  ;;  %p223_p3 = scmp.eq.s32.totalorder %s1507_s12, 1 }
  0x13   : > { %s2742_s13 = scalar_select %p2117_p1, 1, 0 }
  0x14   : > { %s2743_s14 = scalar_select %p2121_p2, 1, 0 }
  0x15   : > { %p2127_p4 = por %p2117_p1, %p65_p0  ;;  %p1508_p5 = scmp.ge.s32.totalorder %s2021_s10, 1 }
  0x16   : > { %p2132_p6 = por %p223_p3, %p65_p0  ;;  %p258_p7 = scmp.lt.s32.totalorder %s2021_s10, 3 }
  0x17   : > { %s2744_s15 = scalar_select %p2127_p4, 1, 0 }
  0x18   : > { %s2745_s16 = scalar_select %p2132_p6, 1, 0 }
  0x19   : > { %s2746_s2 = sld [smem:[#allocation22_spill]]  ;;  %p2140_p8 = pnand %p1508_p5, %p258_p7 }
  0x1a   : > { %s2748_s1 = sld [smem:[#allocation21_spill]] }
  0x1b   : > { %s2747_s20 = scalar_select %p2140_p8, 1, 0 }
  0x1c   : > { %p1717_p10 = pneg %p2140_p8  ;;  %s2750_s3 = sld [smem:[#allocation23_spill]] }
  0x1e   : > { %p2152_p11 = pnand %p1717_p10, %p2117_p1 }
  0x1f   : > { %s282_s19 = sshll.u32 %s2746_s2, 4  ;;  %s283_s19 = int_to_ptr.vmem [resolvable:$true] %s282_s19 }
  0x20   : > { %s271_s23 = sshll.u32 %s2748_s1, 4  ;;  %s1811_s12 = scalar_lea.vmem %s283_s19, 128  ;;  %s272_s23 = int_to_ptr.vmem [resolvable:$true] %s271_s23 }
  0x21   : > { %p1812_p12 = scmp.ne.s32.totalorder %s283_s19, %s1811_s12  ;;  %p1813_p13 = pneg %p2152_p11 }
  0x22   : > { %s293_s11 = sshll.u32 %s2750_s3, 4  ;;  %p1819_p5 = scmp.lt.s32.totalorder %s283_s19, %s283_s19  ;;  %s2159_s11 = int_to_ptr.vmem [resolvable:$true] %s293_s11 }
  0x23   : > { %p1814_p0 = pnand %p1813_p13, %p1812_p12  ;;  %p1820_p7 = scmp.lt.s32.totalorder %s1811_s12, %s1811_s12 }
  0x25   : > { %p1815_p3 = pneg %p1814_p0  ;;  %p1821_p10 = por %p1820_p7, %p1819_p5 }
  0x27   : > { %p1822_p9 = pnand %p1821_p10, %p1815_p3 }
  0x29   : > { %1825 = shalt.err (!%p1822_p9)
}
  0x2a   : > { %s2023_s17 = smov [#allocation7]   ;;  %s1826_s18 = scalar_lea.vmem %s272_s23, 128 }
  0x2b   : > { %1723 = dma.vmem_to_smem (!%p2152_p11), %s283_s19, 128, %s2023_s17, [#allocation8]  }
  0x2c   : > { %p1827_p6 = scmp.ne.s32.totalorder %s272_s23, %s1826_s18  ;;  %p1834_p8 = scmp.lt.s32.totalorder %s272_s23, %s272_s23 }
  0x2d   : > { %p1835_p2 = scmp.lt.s32.totalorder %s1826_s18, %s1826_s18 }
  0x2e   : > { %p1829_p1 = pnand %p1827_p6, %p1813_p13 }
  0x2f   : > { %p1836_p12 = por %p1835_p2, %p1834_p8 }
  0x30   : > { %p1830_p4 = pneg %p1829_p1 }
  0x32   : > { %p1837_p0 = pnand %p1836_p12, %p1830_p4 }
  0x34   : > { %1840 = shalt.err (!%p1837_p0)
}
  0x35   : > { %s2024_s21 = smov [#allocation6]   ;;  %s2751_s4 = sld [smem:[#allocation24_spill]] }
  0x36   : > { %1720 = dma.vmem_to_smem (!%p2152_p11), %s272_s23, 128, %s2024_s21, [#allocation5]  }
  0x37   : > { %s1841_s26 = scalar_lea.vmem %s2159_s11, 64  ;;  %p1849_p4 = scmp.lt.s32.totalorder %s2159_s11, %s2159_s11 }
  0x38   : > { %p1842_p6 = scmp.ne.s32.totalorder %s2159_s11, %s1841_s26  ;;  %p1850_p8 = scmp.lt.s32.totalorder %s1841_s26, %s1841_s26 }
  0x3a   : > { %p1844_p1 = pnand %p1842_p6, %p1813_p13  ;;  %p1851_p9 = por %p1850_p8, %p1849_p4 }
  0x3b   : > { %s304_s25 = sshll.u32 %s2751_s4, 4  ;;  %s305_s25 = int_to_ptr.vmem [resolvable:$true] %s304_s25 }
  0x3c   : > { %p1845_p2 = pneg %p1844_p1 }
  0x3e   : > { %p1852_p3 = pnand %p1851_p9, %p1845_p2 }
  0x40   : > { %1855 = shalt.err (!%p1852_p3)
}
  0x41   : > { %s2025_s12 = smov [#allocation9]   ;;  %s1856_s23 = scalar_lea.vmem %s305_s25, 64 }
  0x42   : > { %1726 = dma.vmem_to_smem (!%p2152_p11), %s2159_s11, 64, %s2025_s12, [#allocation8]  }
  0x43   : > { %p1857_p5 = scmp.ne.s32.totalorder %s305_s25, %s1856_s23  ;;  %p1864_p12 = scmp.lt.s32.totalorder %s305_s25, %s305_s25 }
  0x44   : > { %p1865_p0 = scmp.lt.s32.totalorder %s1856_s23, %s1856_s23 }
  0x45   : > { %p1859_p7 = pnand %p1857_p5, %p1813_p13 }
  0x46   : > { %p1866_p6 = por %p1865_p0, %p1864_p12 }
  0x47   : > { %p1860_p10 = pneg %p1859_p7 }
  0x49   : > { %p1867_p1 = pnand %p1866_p6, %p1860_p10 }
  0x4b   : > { %1870 = shalt.err (!%p1867_p1)
}
  0x4c   : > { %s2026_s17 = smov [#allocation10]   ;;  %s43_s11 = sadd.s32 1, %s2017_s9 }
  0x4d   : > { %1729 = dma.vmem_to_smem (!%p2152_p11), %s305_s25, 64, %s2026_s17, [#allocation11]  }
  0x4e   : > { %s52_s18 = sadd.s32 1, %s2009_s29  ;;  %p45_p13 = scmp.ge.s32.totalorder %s43_s11, 2 }
  0x4f   : > { %p59_p2 = scmp.ne.s32.totalorder %s2009_s29, %s2005_s28  ;;  %p60_p4 = scmp.eq.s32.totalorder %s2021_s10, 0 }
  0x50   : > { %p1745_p8 = scmp.lt.s32.totalorder %s2021_s10, 2  ;;  %s2766_s11 = smov (%p45_p13, %s43_s11), 0 }
  0x51   : > { %p61_p9 = por %p60_p4, %p59_p2  ;;  %p2752_p3 = scmp.ne.s32.totalorder %s2743_s14, 0 }
  0x52   : > { %s47_s21 = ssub.s32 %s2017_s9, %s2766_s11  ;;  %s321_s19 = sand.u32 1, %s2009_s29  }
  0x53   : > { %p2201_p5 = por %p2752_p3, %p59_p2  ;;  %p50_p7 = scmp.eq.s32.totalorder %s47_s21, 0 }
  0x54   : > { %s1514_s22 = sshll.u32 %s321_s19, 6  ;;  %s1611_s25 = sshll.u32 %s2017_s9, 10 }
  0x55   : > { %s2210_s26 = scalar_select %p50_p7, %s2009_s29, %s52_s18  }
  0x56   : > { %s333_s17 = scalar_lea.hbm %s2725_s0, %s1611_s25  ;;  %s325_s1 = scalar_lea.vmem [#allocation2], %s1514_s22 }
  0x57   : > { %s334_s2 = sshll.u32 %s325_s1, 4  ;;  %p2217_p11 = pnand %p1745_p8, %p61_p9  ;;  %s335_s2 = int_to_ptr.vmem [resolvable:$true] %s334_s2 }
  0x58   : > { %s322_s3 = scalar_lea.sflag [#allocation3], %s321_s19  ;;  %s1884_s21 = scalar_lea.vmem %s335_s2, 1024 }
  0x59   : > { %p1873_p10 = pneg %p2217_p11  ;;  %p1885_p12 = scmp.ne.s32.totalorder %s335_s2, %s1884_s21 }
  0x5a   : > { %s2027_s18 = smov [#allocation2]  }
  0x5b   : > { %p1887_p0 = pnand %p1885_p12, %p1873_p10  ;;  %s1889_s4 = sshll.u32 %s2027_s18, 4  ;;  %s1890_s4 = int_to_ptr.vmem [resolvable:$false] %s1889_s4 }
  0x5c   : > { %s1891_s25 = scalar_lea.vmem %s1890_s4, 2048  ;;  %p1892_p1 = scmp.lt.s32.totalorder %s335_s2, %s1890_s4 }
  0x5d   : > { %p1888_p6 = pneg %p1887_p0  ;;  %p1893_p13 = scmp.lt.s32.totalorder %s1891_s25, %s1884_s21 }
  0x5f   : > { %p1894_p2 = por %p1893_p13, %p1892_p1 }
  0x61   : > { %p1895_p4 = pnand %p1894_p2, %p1888_p6 }
  0x63   : > { %1898 = shalt.err (!%p1895_p4)
}
  0x64   : > { %s2028_s1 = smov 128   ;;  %s2029_s22 = smov 8  }
  0x65   : > { %1733 = dma.hbm_to_vmem [thread:$0]  (!%p2217_p11), %s333_s17, 1024, %s335_s2, %s322_s3, %s2028_s1, %s2028_s1, %s2029_s22  }
  0x66   : > { %p2755_p8 = scmp.ne.s32.totalorder %s2747_s20, 0 }
  0x67   : > { %s2228_s19 = sand.u32 (!%p2755_p8), 1, %s2005_s28   ;;  %p2756_p9 = scmp.ne.s32.totalorder (!%p2755_p8), %s2744_s15, 0 }
  0x68   : > { %346 = sbr.rel (%p2755_p8) target bundleno = 543 (0x21f), region = 48  ;;  %s1518_s12 = sshll.u32 (!%p2755_p8), %s2228_s19, 6 }
  0x69   : > { %s349_s4 = scalar_lea.sflag (!%p2755_p8), [#allocation3], %s2228_s19  ;;  %s2232_s23 = scalar_lea.vmem (!%p2755_p8), [#allocation2], %s1518_s12 }
  0x6d   : > { %1976 = dma.done.wait (%p2756_p9), %s349_s4, 1024  }
  0x6e   : > { %1978 = vsyncadd (%p2756_p9), %s349_s4, 4294966272  ;;  %p2757_p3 = scmp.ne.s32.totalorder %s2742_s13, 0 }
  0x70   : > { %1980 = dma.done.wait (%p2757_p3), [#allocation5], 128  }
  0x71   : > { %1982 = vsyncadd (%p2757_p3), [#allocation5], 4294967168 }
  0x72   : > { %1984 = dma.done.wait (%p2757_p3), [#allocation8], 192  }
  0x73   : > { %1986 = vsyncadd (%p2757_p3), [#allocation8], 4294967104 }
  0x74   : > { %1988 = dma.done.wait (%p2757_p3), [#allocation11], 64  }
  0x75   : > { %1990 = vsyncadd (%p2757_p3), [#allocation11], 4294967232 }
  0x76   : > { %373 = sfence }
  0x77   : > { %v2251_v0 = vld [vmem:[%s2232_s23 + $0x8] sm:$0xff]  ;;  %s2253_s2 = sld [smem:[#allocation6]]  ;;  %v2030_v1 = vmov 0.0   ;;  %v2259_v2 = vld [vmem:[%s2232_s23] sm:$0xff]  ;;  %vm2031_vm0 = vmmov 0   ;;  %vm448_vm1 = vcmask 130048  }
  0x78   : > { %1637 = vmatprep.subr.mxu0 %v2030_v1  ;;  %s2256_s3 = sld [smem:[#allocation6 + $0x80]]  ;;  %1641 = vmatprep.mubr.msk.f32.mxu0 %vm2031_vm0, %v2030_v1  ;;  %v2269_v3 = vld [vmem:[%s2730_s5] sm:$0xf]  ;;  %v2276_v4 = vld [vmem:[%s2232_s23 + $0x18] sm:$0xff]  ;;  %v2281_v5 = vld [vmem:[%s2731_s6 + $0x8] sm:$0xff] }
  0x79   : > { %s2263_s13 = sld [smem:[#allocation6 + $0x100]]  ;;  %1638 = vmatpush3.msra.mxu0 %v2251_v0  ;;  %1644 = vmatprep.subr.mxu1 %v2030_v1  ;;  %v2295_v6 = vld [vmem:[%s2232_s23 + $0x10] sm:$0xff]  ;;  %v2307_v8 = vld [vmem:[%s2232_s23 + $0x28] sm:$0xff]  ;;  %v2322_v12 = vld [vmem:[%s2232_s23 + $0x20] sm:$0xff] }
  0x7a   : > { %s2272_s17 = sld [smem:[#allocation6 + $0x180]]  ;;  %1639 = vmatprep.subr.mxu0 %v2030_v1  ;;  %1648 = vmatprep.mubr.msk.f32.mxu1 %vm2031_vm0, %v2030_v1  ;;  %v2340_v20 = vld [vmem:[%s2232_s23 + $0x38] sm:$0xff]  ;;  %v2359_v29 = vld [vmem:[%s2232_s23 + $0x30] sm:$0xff] }
  0x7b   : > { %s2285_s18 = sld [smem:[#allocation6 + $0x200]]  ;;  %1640 = vmatpush3.msra.mxu0 %v2259_v2  ;;  %1645 = vmatpush3.msra.mxu1 %v2281_v5 }
  0x7c   : > { %s2289_s25 = sld [smem:[#allocation6 + $0x280]]  ;;  %1642 = vmatmul.mubr.msk.f32.vlgmr.msra.gmra.mxu0 %vm448_vm1, %v2269_v3  ;;  %1651 = vmatprep.subr.mxu0 %v2030_v1 }
  0x7d   : > { %s2297_s1 = sld [smem:[#allocation6 + $0x300]]  ;;  %1652 = vmatpush3.msra.mxu0 %v2276_v4  ;;  %1655 = vmatprep.mubr.msk.f32.mxu0 %vm2031_vm0, %v2030_v1  ;;  %v421_v7 = vstv %s2253_s2 }
  0x7e   : > { %s2303_s22 = sld [smem:[#allocation6 + $0x380]]  ;;  %1653 = vmatprep.subr.mxu0 %v2030_v1  ;;  %1646 = vmatprep.subr.mxu1 %v2030_v1  ;;  %v452_v9 = vstv %s2256_s3  ;;  %v423_v13 = vmul.f32 %v421_v7, %v2251_v0  ;;  %v422_v15 = vmul.f32 %v421_v7, %v2259_v2 }
  0x7f   : > { %v483_v10 = vstv %s2263_s13  ;;  %s2312_s12 = sld [smem:[#allocation6 + $0x1]]  ;;  %1654 = vmatpush3.msra.mxu0 %v2295_v6  ;;  %v454_v16 = vmul.f32 %v452_v9, %v2251_v0  ;;  %v453_v19 = vmul.f32 %v452_v9, %v2259_v2 }
  0x80   : > { %v514_v11 = vstv %s2272_s17  ;;  %s2316_s4 = sld [smem:[#allocation6 + $0x81]]  ;;  %1656 = vmatmul.mubr.msk.f32.vlgmr.msra.gmra.mxu0 %vm448_vm1, %v2269_v3  ;;  %1665 = vmatprep.subr.mxu0 %v2030_v1  ;;  %v485_v17 = vmul.f32 %v483_v10, %v2251_v0  ;;  %v484_v23 = vmul.f32 %v483_v10, %v2259_v2 }
  0x81   : > { %v545_v14 = vstv %s2285_s18  ;;  %s2327_s2 = sld [smem:[#allocation6 + $0x101]]  ;;  %1666 = vmatpush3.msra.mxu0 %v2307_v8  ;;  %1669 = vmatprep.mubr.msk.f32.mxu0 %vm2031_vm0, %v2030_v1  ;;  %v516_v21 = vmul.f32 %v514_v11, %v2251_v0  ;;  %v515_v24 = vmul.f32 %v514_v11, %v2259_v2 }
  0x82   : > { %v576_v18 = vstv %s2289_s25  ;;  %s2336_s3 = sld [smem:[#allocation6 + $0x181]]  ;;  %1667 = vmatprep.subr.mxu0 %v2030_v1  ;;  %v547_v25 = vmul.f32 %v545_v14, %v2251_v0  ;;  %v546_v28 = vmul.f32 %v545_v14, %v2259_v2 }
  0x83   : > { %v607_v22 = vstv %s2297_s1  ;;  %s2346_s13 = sld [smem:[#allocation6 + $0x201]]  ;;  %1668 = vmatpush3.msra.mxu0 %v2322_v12  ;;  %v578_v26 = vmul.f32 %v576_v18, %v2251_v0  ;;  %v577_v31 = vmul.f32 %v576_v18, %v2259_v2 }
  0x84   : > { %v638_v27 = vstv %s2303_s22  ;;  %s2353_s15 = sld [smem:[#allocation6 + $0x281]]  ;;  %1670 = vmatmul.mubr.msk.f32.vlgmr.msra.gmra.mxu0 %vm448_vm1, %v2269_v3  ;;  %1679 = vmatprep.subr.mxu0 %v2030_v1  ;;  %v609_v30 = vmul.f32 %v607_v22, %v2251_v0  ;;  %v608_v32 = vmul.f32 %v607_v22, %v2259_v2 }
  0x85   : > { %v425_v33 = vstv %s2312_s12  ;;  %s2365_s20 = sld [smem:[#allocation6 + $0x301]]  ;;  %1680 = vmatpush3.msra.mxu0 %v2340_v20  ;;  %1683 = vmatprep.mubr.msk.f32.mxu0 %vm2031_vm0, %v2030_v1  ;;  %v640_v34 = vmul.f32 %v638_v27, %v2251_v0  ;;  %v639_v38 = vmul.f32 %v638_v27, %v2259_v2 }
  0x86   : > { %v427_v35 = vmul.f32 %v2276_v4, %v425_v33  ;;  %v456_v36 = vstv %s2316_s4  ;;  %s2373_s23 = sld [smem:[#allocation6 + $0x381]]  ;;  %v426_v37 = vmul.f32 %v2295_v6, %v425_v33  ;;  %1681 = vmatprep.subr.mxu0 %v2030_v1 }
  0x87   : > { %v458_v39 = vmul.f32 %v2276_v4, %v456_v36  ;;  %v487_v40 = vstv %s2327_s2  ;;  %v457_v41 = vmul.f32 %v2295_v6, %v456_v36  ;;  %s2381_s17 = sld [smem:[#allocation6 + $0x2]]  ;;  %1682 = vmatpush3.msra.mxu0 %v2359_v29 }
  0x88   : > { %v429_v42 = vadd.f32 %v427_v35, %v423_v13  ;;  %v489_v43 = vmul.f32 %v2276_v4, %v487_v40  ;;  %v518_v44 = vstv %s2336_s3  ;;  %v2386_v45 = vadd.f32 %v426_v37, %v422_v15  ;;  %s2388_s14 = sld [smem:[#allocation6 + $0x82]]  ;;  %1684 = vmatmul.mubr.msk.f32.vlgmr.msra.gmra.mxu0 %vm448_vm1, %v2269_v3 }
  0x89   : > { %v460_v46 = vadd.f32 %v458_v39, %v454_v16  ;;  %v520_v47 = vmul.f32 %v2276_v4, %v518_v44  ;;  %v549_v48 = vstv %s2346_s13  ;;  %v2394_v49 = vadd.f32 %v457_v41, %v453_v19  ;;  %s2396_s21 = sld [smem:[#allocation6 + $0x102]] }
  0x8a   : > { %v491_v50 = vadd.f32 %v489_v43, %v485_v17  ;;  %v551_v51 = vmul.f32 %v2276_v4, %v549_v48  ;;  %v580_v52 = vstv %s2353_s15  ;;  %v488_v53 = vmul.f32 %v2295_v6, %v487_v40  ;;  %s2401_s18 = sld [smem:[#allocation6 + $0x182]] }
  0x8b   : > { %v522_v54 = vadd.f32 %v520_v47, %v516_v21  ;;  %v582_v55 = vmul.f32 %v2276_v4, %v580_v52  ;;  %v611_v56 = vstv %s2365_s20  ;;  %v519_v57 = vmul.f32 %v2295_v6, %v518_v44  ;;  %s2406_s25 = sld [smem:[#allocation6 + $0x202]] }
  0x8c   : > { %v553_v58 = vadd.f32 %v551_v51, %v547_v25  ;;  %v613_v59 = vmul.f32 %v2276_v4, %v611_v56  ;;  %v642_v60 = vstv %s2373_s23  ;;  %v490_v61 = vadd.f32 %v488_v53, %v484_v23  ;;  %s2410_s1 = sld [smem:[#allocation6 + $0x282]] }
  0x8d   : > { %v584_v62 = vadd.f32 %v582_v55, %v578_v26  ;;  %v644_v63 = vmul.f32 %v2276_v4, %v642_v60  ;;  %v521_v0 = vadd.f32 %v519_v57, %v515_v24  ;;  %v550_v2 = vmul.f32 %v2295_v6, %v549_v48  ;;  %s2414_s22 = sld [smem:[#allocation6 + $0x302]] }
  0x8e   : > { %v615_v3 = vadd.f32 %v613_v59, %v609_v30  ;;  %v581_v7 = vmul.f32 %v2295_v6, %v580_v52  ;;  %v612_v9 = vmul.f32 %v2295_v6, %v611_v56  ;;  %v643_v10 = vmul.f32 %v2295_v6, %v642_v60  ;;  %s2419_s12 = sld [smem:[#allocation6 + $0x382]] }
  0x8f   : > { %v646_v11 = vadd.f32 %v644_v63, %v640_v34  ;;  %v552_v13 = vadd.f32 %v550_v2, %v546_v28  ;;  %v431_v4 = vstv %s2381_s17  ;;  %v462_v14 = vstv %s2388_s14  ;;  %s2423_s4 = sld [smem:[#allocation6 + $0x3]] }
  0x90   : > { %v583_v15 = vadd.f32 %v581_v7, %v577_v31  ;;  %v614_v16 = vadd.f32 %v612_v9, %v608_v32  ;;  %v645_v17 = vadd.f32 %v643_v10, %v639_v38  ;;  %v433_v18 = vmul.f32 %v2307_v8, %v431_v4  ;;  %s2426_s2 = sld [smem:[#allocation7]] }
  0x91   : > { %v464_v19 = vmul.f32 %v2307_v8, %v462_v14  ;;  %v493_v6 = vstv %s2396_s21  ;;  %v524_v21 = vstv %s2401_s18  ;;  %v555_v22 = vstv %s2406_s25  ;;  %s2432_s3 = sld [smem:[#allocation6 + $0x83]] }
  0x92   : > { %v435_v23 = vadd.f32 %v433_v18, %v429_v42  ;;  %v495_v24 = vmul.f32 %v2307_v8, %v493_v6  ;;  %v526_v25 = vmul.f32 %v2307_v8, %v524_v21  ;;  %v557_v26 = vmul.f32 %v2307_v8, %v555_v22  ;;  %s2437_s13 = sld [smem:[#allocation7 + $0x80]] }
  0x93   : > { %v466_v27 = vadd.f32 %v464_v19, %v460_v46  ;;  %v586_v28 = vstv %s2410_s1  ;;  %v617_v30 = vstv %s2414_s22  ;;  %v432_v31 = vmul.f32 %v2322_v12, %v431_v4  ;;  %s2442_s15 = sld [smem:[#allocation6 + $0x103]]  ;;  %s1523_s22 = sshll.u32 %s2228_s19, 7 }
  0x94   : > { %v497_v32 = vadd.f32 %v495_v24, %v491_v50  ;;  %v528_v33 = vadd.f32 %v526_v25, %v522_v54  ;;  %v559_v34 = vadd.f32 %v557_v26, %v553_v58  ;;  %v588_v35 = vmul.f32 %v2307_v8, %v586_v28  ;;  %s2445_s20 = sld [smem:[#allocation7 + $0x100]] }
  0x95   : > { %v619_v36 = vmul.f32 %v2307_v8, %v617_v30  ;;  %v648_v37 = vstv %s2419_s12  ;;  %v2450_v38 = vadd.f32 %v432_v31, %v2386_v45  ;;  %v463_v39 = vmul.f32 %v2322_v12, %v462_v14  ;;  %s2453_s23 = sld [smem:[#allocation6 + $0x183]] }
  0x96   : > { %v590_v40 = vadd.f32 %v588_v35, %v584_v62  ;;  %v650_v41 = vmul.f32 %v2307_v8, %v648_v37  ;;  %v494_v42 = vmul.f32 %v2322_v12, %v493_v6  ;;  %v525_v43 = vmul.f32 %v2322_v12, %v524_v21  ;;  %s2458_s17 = sld [smem:[#allocation7 + $0x180]] }
  0x97   : > { %v2460_v44 = vadd.f32 %v619_v36, %v615_v3  ;;  %v2463_v46 = vadd.f32 %v463_v39, %v2394_v49  ;;  %v556_v45 = vmul.f32 %v2322_v12, %v555_v22  ;;  %v587_v47 = vmul.f32 %v2322_v12, %v586_v28  ;;  %s2467_s14 = sld [smem:[#allocation6 + $0x203]] }
  0x98   : > { %v2469_v8 = vadd.f32 %v650_v41, %v646_v11  ;;  %v2471_v48 = vadd.f32 %v494_v42, %v490_v61  ;;  %v2473_v50 = vadd.f32 %v525_v43, %v521_v0  ;;  %v618_v51 = vmul.f32 %v2322_v12, %v617_v30  ;;  %s2476_s21 = sld [smem:[#allocation7 + $0x200]] }
  0x99   : > { %v2478_v49 = vadd.f32 %v556_v45, %v552_v13  ;;  %v2480_v52 = vadd.f32 %v587_v47, %v583_v15  ;;  %v649_v53 = vmul.f32 %v2322_v12, %v648_v37  ;;  %v437_v54 = vstv %s2423_s4  ;;  %s2484_s18 = sld [smem:[#allocation6 + $0x283]] }
  0x9a   : > { %v2486_v55 = vadd.f32 %v618_v51, %v614_v16  ;;  %v439_v56 = vmul.f32 %v2340_v20, %v437_v54  ;;  %v443_v57 = vstv %s2426_s2  ;;  %v468_v58 = vstv %s2432_s3  ;;  %s2491_s25 = sld [smem:[#allocation7 + $0x280]]  ;;  %s2522_s3 = scalar_lea.vmem [#allocation12], %s1523_s22 }
  0x9b   : > { %v2493_v59 = vadd.f32 %v649_v53, %v645_v17  ;;  %v470_v60 = vmul.f32 %v2340_v20, %v468_v58  ;;  %v474_v12 = vstv %s2437_s13  ;;  %v499_v61 = vstv %s2442_s15  ;;  %s2498_s1 = sld [smem:[#allocation6 + $0x303]] }
  0x9c   : > { %v441_v62 = vadd.f32 %v439_v56, %v435_v23  ;;  %v501_v63 = vmul.f32 %v2340_v20, %v499_v61  ;;  %v505_v0 = vstv %s2445_s20  ;;  %v530_v2 = vstv %s2453_s23  ;;  %s2504_s12 = sld [smem:[#allocation7 + $0x300]]  ;;  %s1612_s20 = sshll.u32 %s2013_s30, 11 }
  0x9d   : > { %v472_v3 = vadd.f32 %v470_v60, %v466_v27  ;;  %v532_v7 = vmul.f32 %v2340_v20, %v530_v2  ;;  %v536_v9 = vstv %s2458_s17  ;;  %v561_v10 = vstv %s2467_s14  ;;  %s2509_s4 = sld [smem:[#allocation6 + $0x383]]  ;;  %s1327_s23 = sshll.u32 %s2522_s3, 4  ;;  %s2609_s23 = int_to_ptr.vmem [resolvable:$true] %s1327_s23 }
  0x9e   : > { %v445_v11 = vadd.f32 %v443_v57, %v441_v62  ;;  %v503_v13 = vadd.f32 %v501_v63, %v497_v32  ;;  %v563_v4 = vmul.f32 %v2340_v20, %v561_v10  ;;  %v567_v14 = vstv %s2476_s21  ;;  %s2513_s2 = sld [smem:[#allocation7 + $0x380]]  ;;  %s2607_s21 = scalar_lea.hbm %s2732_s7, %s1612_s20 }
  0x9f   : > { %v476_v15 = vadd.f32 %v474_v12, %v472_v3  ;;  %v534_v16 = vadd.f32 %v532_v7, %v528_v33  ;;  %v592_v17 = vstv %s2484_s18  ;;  %v438_v18 = vmul.f32 %v2359_v29, %v437_v54  ;;  %s1307_s18 = scalar_lea.sflag [#allocation4], %s2228_s19 }
  0xa0   : > { %v447_v19 = vmax.f32 %v445_v11, 0.0  ;;  %v507_v6 = vadd.f32 %v505_v0, %v503_v13  ;;  %v565_v21 = vadd.f32 %v563_v4, %v559_v34  ;;  %v594_v22 = vmul.f32 %v2340_v20, %v592_v17 }
  0xa1   : > { %v478_v23 = vmax.f32 %v476_v15, 0.0  ;;  %v538_v24 = vadd.f32 %v536_v9, %v534_v16  ;;  %v598_v25 = vstv %s2491_s25  ;;  %v623_v26 = vstv %s2498_s1  ;;  %s1899_s25 = scalar_lea.vmem %s2609_s23, 2048  ;;  %s2032_s1 = smov [#allocation12]  }
  0xa2   : > { %450 = vst.msk [vmem:[%s2522_s3 + $0x8] sm:$0xff] %vm448_vm1, %v447_v19  ;;  %v509_v27 = vmax.f32 %v507_v6, 0.0  ;;  %v569_v28 = vadd.f32 %v567_v14, %v565_v21  ;;  %v596_v30 = vadd.f32 %v594_v22, %v590_v40  ;;  %v625_v31 = vmul.f32 %v2340_v20, %v623_v26  ;;  %p1900_p7 = scmp.ne.s32.totalorder %s2609_s23, %s1899_s25  ;;  %s1903_s22 = sshll.u32 %s2032_s1, 4  ;;  %s1904_s22 = int_to_ptr.vmem [resolvable:$false] %s1903_s22 }
  0xa3   : > { %1539 = vst.msk [vmem:[%s2522_s3 + $0x18] sm:$0xff] %vm448_vm1, %v478_v23  ;;  %v540_v32 = vmax.f32 %v538_v24, 0.0  ;;  %v629_v33 = vstv %s2504_s12  ;;  %v654_v34 = vstv %s2509_s4  ;;  %v440_v35 = vadd.f32 %v438_v18, %v2450_v38  ;;  %s1905_s12 = scalar_lea.vmem %s1904_s22, 4096  ;;  %p1906_p12 = scmp.lt.s32.totalorder %s2609_s23, %s1904_s22 }
  0xa4   : > { %1546 = vst.msk [vmem:[%s2522_s3 + $0x28] sm:$0xff] %vm448_vm1, %v509_v27  ;;  %v571_v36 = vmax.f32 %v569_v28, 0.0  ;;  %v600_v37 = vadd.f32 %v598_v25, %v596_v30  ;;  %v627_v39 = vadd.f32 %v625_v31, %v2460_v44  ;;  %v656_v41 = vmul.f32 %v2340_v20, %v654_v34  ;;  %p1901_p11 = pnand %p1900_p7, %p2201_p5  ;;  %p1907_p0 = scmp.lt.s32.totalorder %s1905_s12, %s1899_s25 }
  0xa5   : > { %1553 = vst.msk [vmem:[%s2522_s3 + $0x38] sm:$0xff] %vm448_vm1, %v540_v32  ;;  %v660_v40 = vstv %s2513_s2  ;;  %v444_v42 = vadd.f32 %v443_v57, %v440_v35  ;;  %v469_v43 = vmul.f32 %v2359_v29, %v468_v58  ;;  %v500_v45 = vmul.f32 %v2359_v29, %v499_v61 }
  0xa6   : > { %1560 = vst.msk [vmem:[%s2522_s3 + $0x48] sm:$0xff] %vm448_vm1, %v571_v36  ;;  %v602_v38 = vmax.f32 %v600_v37, 0.0  ;;  %v631_v47 = vadd.f32 %v629_v33, %v627_v39  ;;  %v658_v51 = vadd.f32 %v656_v41, %v2469_v8  ;;  %v531_v44 = vmul.f32 %v2359_v29, %v530_v2  ;;  %p1902_p10 = pneg %p1901_p11  ;;  %p1908_p6 = por %p1907_p0, %p1906_p12 }
  0xa7   : > { %v446_v20 = vmax.f32 %v444_v42, 0.0  ;;  %v471_v53 = vadd.f32 %v469_v43, %v2463_v46  ;;  %v502_v54 = vadd.f32 %v500_v45, %v2471_v48  ;;  %v562_v56 = vmul.f32 %v2359_v29, %v561_v10 }
  0xa8   : > { %1567 = vst.msk [vmem:[%s2522_s3 + $0x58] sm:$0xff] %vm448_vm1, %v602_v38  ;;  %v633_v57 = vmax.f32 %v631_v47, 0.0  ;;  %v662_v58 = vadd.f32 %v660_v40, %v658_v51  ;;  %v533_v60 = vadd.f32 %v531_v44, %v2473_v50  ;;  %v593_v61 = vmul.f32 %v2359_v29, %v592_v17  ;;  %p1909_p1 = pnand %p1908_p6, %p1902_p10 }
  0xa9   : > { %449 = vst.msk [vmem:[%s2522_s3] sm:$0xff] %vm448_vm1, %v446_v20  ;;  %v475_v8 = vadd.f32 %v474_v12, %v471_v53  ;;  %v506_v62 = vadd.f32 %v505_v0, %v502_v54  ;;  %v564_v46 = vadd.f32 %v562_v56, %v2478_v49  ;;  %v624_v48 = vmul.f32 %v2359_v29, %v623_v26 }
  0xaa   : > { %1574 = vst.msk [vmem:[%s2522_s3 + $0x68] sm:$0xff] %vm448_vm1, %v633_v57  ;;  %v664_v63 = vmax.f32 %v662_v58, 0.0  ;;  %v537_v2 = vadd.f32 %v536_v9, %v533_v60  ;;  %v595_v50 = vadd.f32 %v593_v61, %v2480_v52  ;;  %v655_v3 = vmul.f32 %v2359_v29, %v654_v34 }
  0xab   : > { %v477_v7 = vmax.f32 %v475_v8, 0.0  ;;  %v508_v10 = vmax.f32 %v506_v62, 0.0  ;;  %v568_v12 = vadd.f32 %v567_v14, %v564_v46  ;;  %v626_v0 = vadd.f32 %v624_v48, %v2486_v55 }
  0xac   : > { %1581 = vst.msk [vmem:[%s2522_s3 + $0x78] sm:$0xff] %vm448_vm1, %v664_v63  ;;  %v539_v49 = vmax.f32 %v537_v2, 0.0  ;;  %v599_v11 = vadd.f32 %v598_v25, %v595_v50  ;;  %v657_v13 = vadd.f32 %v655_v3, %v2493_v59  ;;  %v669_v59 = vld [vmem:[%s2731_s6] sm:$0xff] }
  0xad   : > { %1538 = vst.msk [vmem:[%s2522_s3 + $0x10] sm:$0xff] %vm448_vm1, %v477_v7  ;;  %1545 = vst.msk [vmem:[%s2522_s3 + $0x20] sm:$0xff] %vm448_vm1, %v508_v10  ;;  %v570_v29 = vmax.f32 %v568_v12, 0.0  ;;  %v630_v52 = vadd.f32 %v629_v33, %v626_v0  ;;  %1647 = vmatpush3.msra.mxu1 %v669_v59 }
  0xae   : > { %1552 = vst.msk [vmem:[%s2522_s3 + $0x30] sm:$0xff] %vm448_vm1, %v539_v49  ;;  %v601_v9 = vmax.f32 %v599_v11, 0.0  ;;  %v661_v4 = vadd.f32 %v660_v40, %v657_v13  ;;  %1658 = vmatprep.subr.mxu1 %v2030_v1 }
  0xaf   : > { %1559 = vst.msk [vmem:[%s2522_s3 + $0x40] sm:$0xff] %vm448_vm1, %v570_v29  ;;  %v632_v55 = vmax.f32 %v630_v52, 0.0 }
  0xb0   : > { %1566 = vst.msk [vmem:[%s2522_s3 + $0x50] sm:$0xff] %vm448_vm1, %v601_v9  ;;  %v663_v14 = vmax.f32 %v661_v4, 0.0 }
  0xb1   : > { %1573 = vst.msk [vmem:[%s2522_s3 + $0x60] sm:$0xff] %vm448_vm1, %v632_v55 }
  0xb2   : > { %1580 = vst.msk [vmem:[%s2522_s3 + $0x70] sm:$0xff] %vm448_vm1, %v663_v14 }
 0x13c   : > { %v740_v15 = vpop.f32.mrf.mxu0 }
 0x13d   : > { %1649 = vmatmul.mubr.msk.f32.vlgmr.msra.gmra.mxu1 %vm448_vm1, %v740_v15 }
 0x13e   : > { %v1643_v16 = vpop.f32.mrf.mxu0  ;;  %1659 = vmatpush3.msra.mxu1 %v2281_v5  ;;  %1662 = vmatprep.mubr.msk.f32.mxu1 %vm2031_vm0, %v2030_v1 }
 0x13f   : > { %1660 = vmatprep.subr.mxu1 %v2030_v1 }
 0x140   : > { %v883_v17 = vpop.f32.mrf.mxu0  ;;  %1661 = vmatpush3.msra.mxu1 %v669_v59 }
 0x141   : > { %1663 = vmatmul.mubr.msk.f32.vlgmr.msra.gmra.mxu1 %vm448_vm1, %v883_v17  ;;  %1672 = vmatprep.subr.mxu1 %v2030_v1 }
 0x142   : > { %v1657_v18 = vpop.f32.mrf.mxu0  ;;  %1673 = vmatpush3.msra.mxu1 %v2281_v5  ;;  %1676 = vmatprep.mubr.msk.f32.mxu1 %vm2031_vm0, %v2030_v1 }
 0x143   : > { %1674 = vmatprep.subr.mxu1 %v2030_v1 }
 0x144   : > { %v1026_v19 = vpop.f32.mrf.mxu0  ;;  %1675 = vmatpush3.msra.mxu1 %v669_v59 }
 0x145   : > { %1677 = vmatmul.mubr.msk.f32.vlgmr.msra.gmra.mxu1 %vm448_vm1, %v1026_v19  ;;  %1686 = vmatprep.subr.mxu1 %v2030_v1 }
 0x146   : > { %v1671_v6 = vpop.f32.mrf.mxu0  ;;  %1687 = vmatpush3.msra.mxu1 %v2281_v5  ;;  %1690 = vmatprep.mubr.msk.f32.mxu1 %vm2031_vm0, %v2030_v1 }
 0x147   : > { %1688 = vmatprep.subr.mxu1 %v2030_v1 }
 0x148   : > { %v1169_v21 = vpop.f32.mrf.mxu0  ;;  %1689 = vmatpush3.msra.mxu1 %v669_v59 }
 0x149   : > { %1691 = vmatmul.mubr.msk.f32.vlgmr.msra.gmra.mxu1 %vm448_vm1, %v1169_v21 }
 0x14a   : > { %v1685_v22 = vpop.f32.mrf.mxu0 }
 0x14b   : > { %1912 = shalt.err (!%p1909_p1)
}
 0x14c   : > { %s1913_s4 = scalar_lea.hbm %s2607_s21, 2048  ;;  %s1917_s13 = scalar_lea.hbm %s2732_s7, 4096 }
 0x14d   : > { %p1914_p13 = scmp.ne.s32.totalorder %s2607_s21, %s1913_s4  ;;  %p1918_p8 = scmp.lt.s32.totalorder %s2607_s21, %s2732_s7 }
 0x14e   : > { %p1919_p9 = scmp.lt.s32.totalorder %s1917_s13, %s1913_s4 }
 0x14f   : > { %p1915_p2 = pnand %p1914_p13, %p2201_p5 }
 0x150   : > { %p1920_p3 = por %p1919_p9, %p1918_p8 }
 0x151   : > { %p1916_p4 = pneg %p1915_p2 }
 0x153   : > { %p1921_p7 = pnand %p1920_p3, %p1916_p4 }
 0x155   : > { %1924 = shalt.err (!%p1921_p7)
}
 0x156   : > { %s2033_s17 = smov 128   ;;  %s2034_s14 = smov 8   ;;  %vm1264_vm2 = vcmask 27648  }
 0x157   : > { %1713 = dma.vmem_to_hbm [thread:$0]  (%p2201_p5), %s2609_s23, 2048, %s2607_s21, %s1307_s18, %s2033_s17, %s2033_s17, %s2034_s14  }
 0x158   : > { %s2634_s25 = sld [smem:[#allocation9]]  ;;  %s1693_s14 = smul.u32 12, %s2228_s19 }
 0x159   : > { %s2636_s1 = sld [smem:[#allocation9 + $0x80]] }
 0x15a   : > { %s2638_s22 = sld [smem:[#allocation9 + $0x100]] }
 0x15b   : > { %s1590_s12 = sld [smem:[#allocation9 + $0x1]] }
 0x15c   : > { %s1594_s4 = sld [smem:[#allocation9 + $0x81]] }
 0x15d   : > { %s1600_s2 = sld [smem:[#allocation9 + $0x101]] }
 0x15e   : > { %s2640_s3 = sld [smem:[#allocation9 + $0x2]]  ;;  %v1247_v27 = vstv %s2634_s25  ;;  %s1694_s25 = smul.u32 192, %s2013_s30 }
 0x15f   : > { %s2642_s13 = sld [smem:[#allocation9 + $0x82]]  ;;  %v1267_v28 = vstv %s2636_s1  ;;  %s406_s1 = scalar_lea.vmem [#allocation13], %s1693_s14 }
 0x160   : > { %s2644_s15 = sld [smem:[#allocation9 + $0x102]]  ;;  %v1287_v30 = vstv %s2638_s22  ;;  %s1344_s22 = sshll.u32 %s406_s1, 4  ;;  %s2677_s22 = int_to_ptr.vmem [resolvable:$true] %s1344_s22 }
 0x161   : > { %s2646_s23 = sld [smem:[#allocation9 + $0x3]]  ;;  %v1250_v23 = vstv %s1590_s12  ;;  %s2675_s30 = scalar_lea.hbm %s2733_s8, %s1694_s25 }
 0x162   : > { %s2648_s21 = sld [smem:[#allocation9 + $0x83]]  ;;  %v1270_v24 = vstv %s1594_s4 }
 0x163   : > { %s2650_s18 = sld [smem:[#allocation9 + $0x103]]  ;;  %v1290_v26 = vstv %s1600_s2 }
 0x164   : > { %s2652_s20 = sld [smem:[#allocation10]]  ;;  %v1254_v31 = vstv %s2640_s3  ;;  %s1312_s3 = scalar_lea.sflag [#allocation14], %s2228_s19 }
 0x165   : > { %s2658_s17 = sld [smem:[#allocation10 + $0x80]]  ;;  %v1274_v35 = vstv %s2642_s13  ;;  %s1925_s13 = scalar_lea.vmem %s2677_s22, 192 }
 0x166   : > { %v1294_v36 = vstv %s2644_s15  ;;  %s2663_s12 = sld [smem:[#allocation10 + $0x100]]  ;;  %p1926_p11 = scmp.ne.s32.totalorder %s2677_s22, %s1925_s13 }
 0x167   : > { %v1258_v42 = vstv %s2646_s23  ;;  %s2035_s15 = smov [#allocation13]  }
 0x168   : > { %v1278_v53 = vstv %s2648_s21  ;;  %p1927_p10 = pnand %p1926_p11, %p2201_p5  ;;  %s1929_s23 = sshll.u32 %s2035_s15, 4  ;;  %s1930_s23 = int_to_ptr.vmem [resolvable:$false] %s1929_s23 }
 0x169   : > { %v1298_v54 = vstv %s2650_s18  ;;  %s1931_s21 = scalar_lea.vmem %s1930_s23, 384  ;;  %p1932_p0 = scmp.lt.s32.totalorder %s2677_s22, %s1930_s23 }
 0x16a   : > { %v1262_v48 = vstv %s2652_s20  ;;  %p1928_p12 = pneg %p1927_p10  ;;  %p1933_p6 = scmp.lt.s32.totalorder %s1931_s21, %s1925_s13 }
 0x16b   : > { %v1282_v63 = vstv %s2658_s17 }
 0x16c   : > { %v1302_v2 = vstv %s2663_s12  ;;  %p1934_p1 = por %p1933_p6, %p1932_p0 }
 0x16e   : > { %p1935_p13 = pnand %p1934_p1, %p1928_p12 }
 0x1fd   : > { %v813_v1 = vpop.f32.mrf.mxu1 }
 0x1fe   : > { %v1248_v39 = vmul.f32 %v1247_v27, %v813_v1  ;;  %v1268_v41 = vmul.f32 %v1267_v28, %v813_v1  ;;  %v1288_v43 = vmul.f32 %v1287_v30, %v813_v1 }
 0x1ff   : > { %v1650_v5 = vpop.f32.mrf.mxu1 }
 0x201   : > { %v956_v25 = vpop.f32.mrf.mxu1 }
 0x202   : > { %v1251_v32 = vmul.f32 %v1250_v23, %v956_v25  ;;  %v1271_v33 = vmul.f32 %v1270_v24, %v956_v25  ;;  %v1291_v37 = vmul.f32 %v1290_v26, %v956_v25 }
 0x203   : > { %v1664_v34 = vpop.f32.mrf.mxu1 }
 0x204   : > { %v1252_v51 = vadd.f32 %v1251_v32, %v1248_v39  ;;  %v1272_v44 = vadd.f32 %v1271_v33, %v1268_v41  ;;  %v1292_v56 = vadd.f32 %v1291_v37, %v1288_v43 }
 0x205   : > { %v1099_v40 = vpop.f32.mrf.mxu1 }
 0x206   : > { %v1255_v45 = vmul.f32 %v1254_v31, %v1099_v40  ;;  %v1275_v38 = vmul.f32 %v1274_v35, %v1099_v40  ;;  %v1295_v47 = vmul.f32 %v1294_v36, %v1099_v40 }
 0x207   : > { %v1678_v20 = vpop.f32.mrf.mxu1 }
 0x208   : > { %v1256_v57 = vadd.f32 %v1255_v45, %v1252_v51  ;;  %v1276_v58 = vadd.f32 %v1275_v38, %v1272_v44  ;;  %v1296_v61 = vadd.f32 %v1295_v47, %v1292_v56 }
 0x209   : > { %v1242_v60 = vpop.f32.mrf.mxu1 }
 0x20a   : > { %v1259_v8 = vmul.f32 %v1258_v42, %v1242_v60  ;;  %v1279_v62 = vmul.f32 %v1278_v53, %v1242_v60  ;;  %v1299_v46 = vmul.f32 %v1298_v54, %v1242_v60 }
 0x20b   : > { %v1692_v50 = vpop.f32.mrf.mxu1 }
 0x20c   : > { %v1260_v3 = vadd.f32 %v1259_v8, %v1256_v57  ;;  %v1280_v7 = vadd.f32 %v1279_v62, %v1276_v58  ;;  %v1300_v10 = vadd.f32 %v1299_v46, %v1296_v61 }
 0x20e   : > { %v1263_v12 = vadd.f32 %v1262_v48, %v1260_v3  ;;  %v1283_v0 = vadd.f32 %v1282_v63, %v1280_v7  ;;  %v1303_v49 = vadd.f32 %v1302_v2, %v1300_v10 }
 0x210   : > { %1265 = vst.msk [vmem:[%s406_s1] sm:$0xf] %vm1264_vm2, %v1263_v12  ;;  %1598 = vst.msk [vmem:[%s406_s1 + $0x4] sm:$0xf] %vm1264_vm2, %v1283_v0 }
 0x211   : > { %1604 = vst.msk [vmem:[%s406_s1 + $0x8] sm:$0xf] %vm1264_vm2, %v1303_v49 }
 0x212   : > { %1938 = shalt.err (!%p1935_p13)
}
 0x213   : > { %s1939_s18 = scalar_lea.hbm %s2675_s30, 192  ;;  %s1943_s14 = scalar_lea.hbm %s2733_s8, 384 }
 0x214   : > { %p1940_p2 = scmp.ne.s32.totalorder %s2675_s30, %s1939_s18  ;;  %p1944_p9 = scmp.lt.s32.totalorder %s2675_s30, %s2733_s8 }
 0x215   : > { %p1945_p3 = scmp.lt.s32.totalorder %s1943_s14, %s1939_s18 }
 0x216   : > { %p1941_p4 = pnand %p1940_p2, %p2201_p5 }
 0x217   : > { %p1946_p7 = por %p1945_p3, %p1944_p9 }
 0x218   : > { %p1942_p8 = pneg %p1941_p4 }
 0x21a   : > { %p1947_p11 = pnand %p1946_p7, %p1942_p8 }
 0x21c   : > { %1950 = shalt.err (!%p1947_p11)
}
 0x21d   : > { %s2036_s1 = smov 64   ;;  %s2037_s4 = smov 4  }
 0x21e   : > { %1714 = dma.vmem_to_hbm [thread:$0]  (%p2201_p5), %s2677_s22, 192, %s2675_s30, %s1312_s3, %s2036_s1, %s2036_s1, %s2037_s4  }
 0x21f PF: > { %s1359_s2 = sand.u32 1, %s2001_s27   ;;  %p2758_p10 = scmp.ne.s32.totalorder %s2745_s16, 0 }
 0x220   : > { %p2759_p12 = scmp.ge.s32.totalorder %s2021_s10, 2  ;;  %s1360_s13 = scalar_lea.sflag [#allocation4], %s1359_s2 }
 0x222   : > { %p1735_p0 = pnand %p2759_p12, %p2758_p10 }
 0x224   : > { %p1736_p6 = pneg %p1735_p0 }
 0x226   : > { %1992 = dma.done.wait (%p1736_p6), %s1360_s13, 2048  }
 0x227   : > { %1994 = vsyncadd (%p1736_p6), %s1360_s13, 4294965248  ;;  %s1369_s15 = scalar_lea.sflag [#allocation14], %s1359_s2 }
 0x228   : > { %1996 = dma.done.wait (%p1736_p6), %s1369_s15, 192  }
 0x229   : > { %1998 = vsyncadd (%p1736_p6), %s1369_s15, 4294967104  ;;  %s31_s10 = sadd.s32 1, %s2021_s10   ;;  %s2760_s27 = smov %s2005_s28 }
 0x22a   : > { %p28_p1 = scmp.ge.s32.totalorder %s31_s10, 4   ;;  %s2761_s28 = smov %s2009_s29 }
 0x22b   : > { %s2762_s29 = smov %s2210_s26  ;;  %s2763_s30 = smov %s2017_s9 }
 0x22c   : > { %s2764_s9 = smov %s2766_s11  ;;  %30 = sbr.rel (!%p28_p1) target bundleno = 16 (0x10), region = 139 }
 0x231   :  { %1374 = vsyncpa [#allocation3], 1 }
 0x232   :  { %1376 = vsyncpa [#allocation3 + $0x1], 1 }
 0x233   :  { %1377 = vsyncpa [#allocation4], 1 }
 0x234   :  { %1379 = vsyncpa [#allocation4 + $0x1], 1 }
 0x235   :  { %1380 = vsyncpa [#allocation14], 1 }
 0x236   :  { %1382 = vsyncpa [#allocation14 + $0x1], 1 }
 0x237   :  { %1383 = vsyncpa [#allocation5], 1 }
 0x238   :  { %1385 = vsyncpa [#allocation5 + $0x1], 1 }
 0x239   :  { %1386 = vsyncpa [#allocation8], 1 }
 0x23a   :  { %1387 = vsyncpa [#allocation11], 1 }

</bundles_post_ra>
